<compile_context>
chip_gen: v7x
topology: tpu7x:2x2x1
jax: 0.10.0
libtpu: 0.0.40
codegen_flags: <defaults>
</compile_context>

<pallas_src>
import functools
import math

import numpy as np
import jax
import jax.numpy as jnp
from jax.experimental import pallas as pl
from jax.experimental.pallas import tpu as pltpu

EPS = 1e-5                 # torch.nn.BatchNorm1d default eps
TARGET_TILE_ROWS = 2048    # ~2-4K rows/tile fits v7x's 64 MiB VMEM with headroom


# ------------------------- Pallas kernel -----------------------------------
def _cnn_kernel(seq_len,
                prob_ref, emb_ref,
                pw0, pw1, pw2, psh,
                c1p0, c1p1, c1p2, c1e0, c1e1, c1e2, c1sh,
                c2w0, c2w1, c2w2, c2sh,
                c3w0, c3w1, c3w2, c3sh,
                c4w0, c4w1, c4w2, c4sh,
                l1w, l1b, l2w, l2b,
                out_ref):
    n = prob_ref.shape[0]
    # tile row count is a multiple of seq_len -> local position == true position
    pos = jax.lax.broadcasted_iota(jnp.int32, (n, 1), 0) % seq_len
    first_mask = pos == 0
    last_mask = pos == (seq_len - 1)

    def taps(x):
        # x[r-1], x[r], x[r+1] with conv zero padding / per-sequence isolation
        x_lm1 = jnp.where(first_mask, 0.0, pltpu.roll(x, shift=1, axis=0))
        x_lp1 = jnp.where(last_mask, 0.0, pltpu.roll(x, shift=n - 1, axis=0))
        return x_lm1, x, x_lp1

    def mm(x, w_ref):
        # bf16 MXU dot, f32 accumulation
        return jnp.dot(x.astype(jnp.bfloat16), w_ref[...],
                       preferred_element_type=jnp.float32)

    def conv(x, w0, w1, w2, sh):
        xm, xc, xp = taps(x)
        y = mm(xm, w0) + mm(xc, w1) + mm(xp, w2) + sh[...]
        return jnp.maximum(y, 0.0)

    prob = prob_ref[...]
    embx = emb_ref[...]

    # prob_conv block
    p = conv(prob, pw0, pw1, pw2, psh)                       # (n, emb)

    # first stacked ConvBlock over the *virtual* concat [p | tok | sent]:
    # partial dots against the p-rows and emb-rows of the weight (no concat).
    pm, pc, pp = taps(p)
    em, ec, ep = taps(embx)
    y = (mm(pm, c1p0) + mm(pc, c1p1) + mm(pp, c1p2)
         + mm(em, c1e0) + mm(ec, c1e1) + mm(ep, c1e2) + c1sh[...])
    x = jnp.maximum(y, 0.0)                                  # (n, cnn)

    x = conv(x, c2w0, c2w1, c2w2, c2sh)                      # (n, 2*cnn)
    x = conv(x, c3w0, c3w1, c3w2, c3sh)                      # (n, 4*cnn)
    x = conv(x, c4w0, c4w1, c4w2, c4sh)                      # (n, 8*cnn)

    # lin: Linear(8*cnn -> cnn) + ReLU + Linear(cnn -> 2)
    h = jnp.maximum(mm(x, l1w) + l1b[...], 0.0)
    out_ref[...] = mm(h, l2w) + l2b[...]


# ------------------------- one-time parameter prep ---------------------------
def prepare_params(params):
    """Fold BN(eval) into per-tap bf16 conv weights; hoist all transposes."""
    def fold_taps(cb):
        w, b, gamma, beta, mean, var = cb        # w: torch layout (Cout, Cin, K=3)
        scale = gamma / jnp.sqrt(var + EPS)
        wk = jnp.transpose(w, (2, 1, 0)) * scale[None, None, :]   # (3, Cin, Cout)
        shift = ((b - mean) * scale + beta)[None, :].astype(jnp.float32)
        return [wk[k].astype(jnp.bfloat16) for k in range(3)], shift

    emb = params["char_emb"].shape[1]

    p_taps, p_sh = fold_taps(params["prob_conv"])
    c1_taps, c1_sh = fold_taps(params["convs"][0])
    c2_taps, c2_sh = fold_taps(params["convs"][1])
    c3_taps, c3_sh = fold_taps(params["convs"][2])
    c4_taps, c4_sh = fold_taps(params["convs"][3])

    # split c1's per-tap weights into prob-conv rows and embedding rows
    c1_p = [t[:emb] for t in c1_taps]
    c1_e = [t[emb:] for t in c1_taps]

    l1w = params["lin1_w"].T.astype(jnp.bfloat16)            # (8*cnn, cnn)
    l1b = params["lin1_b"][None, :].astype(jnp.float32)
    l2w = params["lin2_w"].T.astype(jnp.bfloat16)            # (cnn, 2)
    l2b = params["lin2_b"][None, :].astype(jnp.float32)

    weights = (p_taps + [p_sh]
               + c1_p + c1_e + [c1_sh]
               + c2_taps + [c2_sh]
               + c3_taps + [c3_sh]
               + c4_taps + [c4_sh]
               + [l1w, l1b, l2w, l2b])
    return dict(char_emb=params["char_emb"],
                sent_emb=params["sent_emb"],
                weights=[jnp.asarray(w) for w in weights])


# ------------------------- forward wrapper -----------------------------------
@jax.jit
def tweet_sentiment_cnn_forward(prepared, start_p, end_p, tokens, sentiment):
    B, L, M = start_p.shape
    emb = prepared["char_emb"].shape[1]
    N = B * L

    # glue: embedding gathers, batch folding, channels-last activation slabs
    prob_in = jnp.concatenate([start_p, end_p], axis=-1).astype(jnp.float32)
    prob_in = prob_in.reshape(N, 2 * M)                                  # (N, 2M)
    tok_emb = jnp.take(prepared["char_emb"], tokens, axis=0)             # (B, L, emb)
    sent_emb = jnp.take(prepared["sent_emb"], sentiment, axis=0)         # (B, emb)
    sent_b = jnp.broadcast_to(sent_emb[:, None, :], (B, L, emb))
    emb_in = jnp.concatenate([tok_emb, sent_b], -1).reshape(N, 2 * emb)
    emb_in = emb_in.astype(jnp.float32)

    # row tile: multiple of L (sequences never straddle a tile) AND of 8 sublanes
    unit = L * (8 // math.gcd(L, 8))
    tile = max(unit, (TARGET_TILE_ROWS // unit) * unit)
    tile = min(tile, pl.cdiv(N, unit) * unit)
    n_pad = pl.cdiv(N, tile) * tile
    if n_pad != N:
        prob_in = jnp.pad(prob_in, ((0, n_pad - N), (0, 0)))
        emb_in = jnp.pad(emb_in, ((0, n_pad - N), (0, 0)))

    weights = prepared["weights"]
    row_spec = lambda c: pl.BlockSpec((tile, c), lambda i: (i, 0))
    const_spec = lambda w: pl.BlockSpec(w.shape, lambda i: (0, 0))   # resident weights

    out = pl.pallas_call(
        functools.partial(_cnn_kernel, L),
        out_shape=jax.ShapeDtypeStruct((n_pad, 2), jnp.float32),
        grid=(n_pad // tile,),
        in_specs=[row_spec(2 * M), row_spec(2 * emb)]
                 + [const_spec(w) for w in weights],
        out_specs=pl.BlockSpec((tile, 2), lambda i: (i, 0)),
        compiler_params=pltpu.CompilerParams(
            dimension_semantics=("parallel",),        # shard tiles across v7x's 2 TCs
            vmem_limit_bytes=48 * 1024 * 1024),
    )(prob_in, emb_in, *weights)
    return out[:N].reshape(B, L, 2)


# ------------------------- deterministic params -----------------------------
def init_params(key, n_models=7, n_tokens=64, emb_dim=16, cnn_dim=16):
    keys = iter(jax.random.split(key, 64))
    nk = lambda: next(keys)

    def conv_block(cin, cout, k=3):
        w = 0.1 * jax.random.normal(nk(), (cout, cin, k), jnp.float32)
        b = 0.1 * jax.random.normal(nk(), (cout,), jnp.float32)
        gamma = 1.0 + 0.1 * jax.random.normal(nk(), (cout,), jnp.float32)
        beta = 0.1 * jax.random.normal(nk(), (cout,), jnp.float32)
        mean = 0.1 * jax.random.normal(nk(), (cout,), jnp.float32)
        var = 1.0 + 0.1 * jax.random.uniform(nk(), (cout,), jnp.float32)
        return (w, b, gamma, beta, mean, var)

    char_emb = 0.5 * jax.random.normal(nk(), (n_tokens, emb_dim), jnp.float32)
    char_emb = char_emb.at[0].set(0.0)           # padding_idx=0
    sent_emb = 0.5 * jax.random.normal(nk(), (3, emb_dim), jnp.float32)
    sent_emb = sent_emb.at[2].set(0.0)           # padding_idx=-1 -> row 2

    return dict(
        char_emb=char_emb,
        sent_emb=sent_emb,
        prob_conv=conv_block(2 * n_models, emb_dim),
        convs=[conv_block(3 * emb_dim, cnn_dim),
               conv_block(cnn_dim, 2 * cnn_dim),
               conv_block(2 * cnn_dim, 4 * cnn_dim),
               conv_block(4 * cnn_dim, 8 * cnn_dim)],
        lin1_w=0.1 * jax.random.normal(nk(), (cnn_dim, 8 * cnn_dim), jnp.float32),
        lin1_b=0.1 * jax.random.normal(nk(), (cnn_dim,), jnp.float32),
        lin2_w=0.1 * jax.random.normal(nk(), (2, cnn_dim), jnp.float32),
        lin2_b=0.1 * jax.random.normal(nk(), (2,), jnp.float32),
    )


# ------------------------- pure-JAX reference -------------------------------
def reference_forward(params, start_p, end_p, tokens, sentiment):
    def conv_block(x, cb):                                # x: (B, C, L)
        w, b, gamma, beta, mean, var = cb
        y = jax.lax.conv_general_dilated(
            x, w, (1,), [(1, 1)], dimension_numbers=("NCH", "OIH", "NCH"))
        y = y + b[None, :, None]
        y = (y - mean[None, :, None]) * (gamma / jnp.sqrt(var + EPS))[None, :, None] \
            + beta[None, :, None]
        return jnp.maximum(y, 0.0)

    B, L, M = start_p.shape
    prob = jnp.transpose(jnp.concatenate([start_p, end_p], -1), (0, 2, 1))
    prob = conv_block(prob, params["prob_conv"])
    tok = jnp.transpose(jnp.take(params["char_emb"], tokens, axis=0), (0, 2, 1))
    sent = jnp.take(params["sent_emb"], sentiment, axis=0)[:, :, None]
    sent = jnp.broadcast_to(sent, (B, sent.shape[1], L))
    x = jnp.concatenate([prob, tok, sent], axis=1)
    for cb in params["convs"]:
        x = conv_block(x, cb)
    x = jnp.transpose(x, (0, 2, 1))                       # (B, L, 8*cnn)
    h = jnp.maximum(x @ params["lin1_w"].T + params["lin1_b"], 0.0)
    return h @ params["lin2_w"].T + params["lin2_b"]      # (B, L, 2)


# ------------------------- main ----------------------------------------------
if __name__ == "__main__":
    key = jax.random.PRNGKey(0)
    k1, k2, k3, k4, kp = jax.random.split(key, 5)

    B, L, n_models, n_tokens = 2, 8, 7, 64
    start_p = jax.nn.softmax(jax.random.normal(k1, (B, L, n_models)), axis=1)
    end_p = jax.nn.softmax(jax.random.normal(k2, (B, L, n_models)), axis=1)
    tokens = jax.random.randint(k3, (B, L), 0, n_tokens)
    sentiment = jax.random.randint(k4, (B,), 0, 3)

    params = init_params(kp, n_models=n_models, n_tokens=n_tokens)
    prepared = prepare_params(params)        # one-time BN folding / weight prep

    out = tweet_sentiment_cnn_forward(prepared, start_p, end_p, tokens, sentiment)
    out = jax.block_until_ready(out)
    assert out.shape == (B, L, 2)

    ref = reference_forward(params, start_p, end_p, tokens, sentiment)
    # bf16 MXU dots vs the f32 reference -> loosened tolerance
    np.testing.assert_allclose(np.asarray(out), np.asarray(ref),
                               rtol=5e-2, atol=5e-2)
    print("KERNEL_OK")
</pallas_src>

<mosaic_0001>
module attributes {stable_mosaic.version = 11 : i64} {
  func.func @_cnn_kernel(%arg0: i32, %arg1: memref<16x14xf32, #tpu.memory_space<vmem>>, %arg2: memref<16x32xf32, #tpu.memory_space<vmem>>, %arg3: memref<14x16xbf16, #tpu.memory_space<vmem>>, %arg4: memref<14x16xbf16, #tpu.memory_space<vmem>>, %arg5: memref<14x16xbf16, #tpu.memory_space<vmem>>, %arg6: memref<1x16xf32, #tpu.memory_space<vmem>>, %arg7: memref<16x16xbf16, #tpu.memory_space<vmem>>, %arg8: memref<16x16xbf16, #tpu.memory_space<vmem>>, %arg9: memref<16x16xbf16, #tpu.memory_space<vmem>>, %arg10: memref<32x16xbf16, #tpu.memory_space<vmem>>, %arg11: memref<32x16xbf16, #tpu.memory_space<vmem>>, %arg12: memref<32x16xbf16, #tpu.memory_space<vmem>>, %arg13: memref<1x16xf32, #tpu.memory_space<vmem>>, %arg14: memref<16x32xbf16, #tpu.memory_space<vmem>>, %arg15: memref<16x32xbf16, #tpu.memory_space<vmem>>, %arg16: memref<16x32xbf16, #tpu.memory_space<vmem>>, %arg17: memref<1x32xf32, #tpu.memory_space<vmem>>, %arg18: memref<32x64xbf16, #tpu.memory_space<vmem>>, %arg19: memref<32x64xbf16, #tpu.memory_space<vmem>>, %arg20: memref<32x64xbf16, #tpu.memory_space<vmem>>, %arg21: memref<1x64xf32, #tpu.memory_space<vmem>>, %arg22: memref<64x128xbf16, #tpu.memory_space<vmem>>, %arg23: memref<64x128xbf16, #tpu.memory_space<vmem>>, %arg24: memref<64x128xbf16, #tpu.memory_space<vmem>>, %arg25: memref<1x128xf32, #tpu.memory_space<vmem>>, %arg26: memref<128x16xbf16, #tpu.memory_space<vmem>>, %arg27: memref<1x16xf32, #tpu.memory_space<vmem>>, %arg28: memref<16x2xbf16, #tpu.memory_space<vmem>>, %arg29: memref<1x2xf32, #tpu.memory_space<vmem>>, %arg30: memref<16x2xf32, #tpu.memory_space<vmem>>) attributes {dimension_semantics = [#tpu.dimension_semantics<parallel>], iteration_bounds = array<i64: 1>, scalar_prefetch = 0 : i64, scratch_operands = 0 : i64, tpu.core_type = #tpu.core_type<tc>, window_params = [{transform_indices = @transform_0, window_bounds = array<i64: 16, 14>}, {transform_indices = @transform_1, window_bounds = array<i64: 16, 32>}, {pipeline_mode = #tpu.pipeline_mode<synchronous>, transform_indices = @transform_2, window_bounds = array<i64: 14, 16>}, {pipeline_mode = #tpu.pipeline_mode<synchronous>, transform_indices = @transform_3, window_bounds = array<i64: 14, 16>}, {pipeline_mode = #tpu.pipeline_mode<synchronous>, transform_indices = @transform_4, window_bounds = array<i64: 14, 16>}, {pipeline_mode = #tpu.pipeline_mode<synchronous>, transform_indices = @transform_5, window_bounds = array<i64: 1, 16>}, {pipeline_mode = #tpu.pipeline_mode<synchronous>, transform_indices = @transform_6, window_bounds = array<i64: 16, 16>}, {pipeline_mode = #tpu.pipeline_mode<synchronous>, transform_indices = @transform_7, window_bounds = array<i64: 16, 16>}, {pipeline_mode = #tpu.pipeline_mode<synchronous>, transform_indices = @transform_8, window_bounds = array<i64: 16, 16>}, {pipeline_mode = #tpu.pipeline_mode<synchronous>, transform_indices = @transform_9, window_bounds = array<i64: 32, 16>}, {pipeline_mode = #tpu.pipeline_mode<synchronous>, transform_indices = @transform_10, window_bounds = array<i64: 32, 16>}, {pipeline_mode = #tpu.pipeline_mode<synchronous>, transform_indices = @transform_11, window_bounds = array<i64: 32, 16>}, {pipeline_mode = #tpu.pipeline_mode<synchronous>, transform_indices = @transform_12, window_bounds = array<i64: 1, 16>}, {pipeline_mode = #tpu.pipeline_mode<synchronous>, transform_indices = @transform_13, window_bounds = array<i64: 16, 32>}, {pipeline_mode = #tpu.pipeline_mode<synchronous>, transform_indices = @transform_14, window_bounds = array<i64: 16, 32>}, {pipeline_mode = #tpu.pipeline_mode<synchronous>, transform_indices = @transform_15, window_bounds = array<i64: 16, 32>}, {pipeline_mode = #tpu.pipeline_mode<synchronous>, transform_indices = @transform_16, window_bounds = array<i64: 1, 32>}, {pipeline_mode = #tpu.pipeline_mode<synchronous>, transform_indices = @transform_17, window_bounds = array<i64: 32, 64>}, {pipeline_mode = #tpu.pipeline_mode<synchronous>, transform_indices = @transform_18, window_bounds = array<i64: 32, 64>}, {pipeline_mode = #tpu.pipeline_mode<synchronous>, transform_indices = @transform_19, window_bounds = array<i64: 32, 64>}, {pipeline_mode = #tpu.pipeline_mode<synchronous>, transform_indices = @transform_20, window_bounds = array<i64: 1, 64>}, {pipeline_mode = #tpu.pipeline_mode<synchronous>, transform_indices = @transform_21, window_bounds = array<i64: 64, 128>}, {pipeline_mode = #tpu.pipeline_mode<synchronous>, transform_indices = @transform_22, window_bounds = array<i64: 64, 128>}, {pipeline_mode = #tpu.pipeline_mode<synchronous>, transform_indices = @transform_23, window_bounds = array<i64: 64, 128>}, {pipeline_mode = #tpu.pipeline_mode<synchronous>, transform_indices = @transform_24, window_bounds = array<i64: 1, 128>}, {pipeline_mode = #tpu.pipeline_mode<synchronous>, transform_indices = @transform_25, window_bounds = array<i64: 128, 16>}, {pipeline_mode = #tpu.pipeline_mode<synchronous>, transform_indices = @transform_26, window_bounds = array<i64: 1, 16>}, {pipeline_mode = #tpu.pipeline_mode<synchronous>, transform_indices = @transform_27, window_bounds = array<i64: 16, 2>}, {pipeline_mode = #tpu.pipeline_mode<synchronous>, transform_indices = @transform_28, window_bounds = array<i64: 1, 2>}, {transform_indices = @transform_29, window_bounds = array<i64: 16, 2>}]} {
    %0 = tpu.iota {dimensions = array<i32: 0>} : vector<16x1xi32>
    %c8_i32 = arith.constant 8 : i32
    %c0_i32 = arith.constant 0 : i32
    %1 = arith.cmpi eq, %c8_i32, %c0_i32 : i32
    %c1_i32 = arith.constant 1 : i32
    %2 = arith.select %1, %c1_i32, %c8_i32 : i32
    %3 = vector.broadcast %2 : i32 to vector<16x1xi32>
    %4 = arith.remsi %0, %3 : vector<16x1xi32>
    %c0_i32_0 = arith.constant 0 : i32
    %5 = vector.broadcast %c0_i32_0 : i32 to vector<16x1xi32>
    %6 = arith.cmpi ne, %4, %5 : vector<16x1xi32>
    %c0_i32_1 = arith.constant 0 : i32
    %7 = vector.broadcast %c0_i32_1 : i32 to vector<16x1xi32>
    %8 = arith.cmpi slt, %4, %7 : vector<16x1xi32>
    %c0_i32_2 = arith.constant 0 : i32
    %9 = arith.cmpi slt, %2, %c0_i32_2 : i32
    %10 = vector.broadcast %9 : i1 to vector<16x1xi1>
    %11 = vector.broadcast %10 : vector<16x1xi1> to vector<16x1xi1>
    %12 = arith.xori %8, %11 : vector<16x1xi1>
    %13 = arith.andi %12, %6 : vector<16x1xi1>
    %14 = vector.broadcast %2 : i32 to vector<16x1xi32>
    %15 = arith.addi %4, %14 : vector<16x1xi32>
    %16 = arith.select %13, %15, %4 : vector<16x1xi1>, vector<16x1xi32>
    %c0_i32_3 = arith.constant 0 : i32
    %17 = vector.broadcast %c0_i32_3 : i32 to vector<16x1xi32>
    %18 = arith.cmpi eq, %16, %17 : vector<16x1xi32>
    %c7_i32 = arith.constant 7 : i32
    %19 = vector.broadcast %c7_i32 : i32 to vector<16x1xi32>
    %20 = arith.cmpi eq, %16, %19 : vector<16x1xi32>
    %c0 = arith.constant 0 : index
    %c0_4 = arith.constant 0 : index
    %21 = vector.load %arg1[%c0, %c0_4] : memref<16x14xf32, #tpu.memory_space<vmem>>, vector<16x14xf32>
    %c0_5 = arith.constant 0 : index
    %c0_6 = arith.constant 0 : index
    %22 = vector.load %arg2[%c0_5, %c0_6] : memref<16x32xf32, #tpu.memory_space<vmem>>, vector<16x32xf32>
    %c1_i32_7 = arith.constant 1 : i32
    %23 = tpu.dynamic_rotate %21 by %c1_i32_7 dim 0 : vector<16x14xf32>, i32 -> vector<16x14xf32>
    %cst = arith.constant 0.000000e+00 : f32
    %24 = vector.shape_cast %18 : vector<16x1xi1> to vector<16x1xi1>
    %25 = vector.broadcast %24 : vector<16x1xi1> to vector<16x14xi1>
    %26 = vector.broadcast %cst : f32 to vector<16x14xf32>
    %27 = arith.select %25, %26, %23 : vector<16x14xi1>, vector<16x14xf32>
    %c15_i32 = arith.constant 15 : i32
    %28 = tpu.dynamic_rotate %21 by %c15_i32 dim 0 : vector<16x14xf32>, i32 -> vector<16x14xf32>
    %cst_8 = arith.constant 0.000000e+00 : f32
    %29 = vector.shape_cast %20 : vector<16x1xi1> to vector<16x1xi1>
    %30 = vector.broadcast %29 : vector<16x1xi1> to vector<16x14xi1>
    %31 = vector.broadcast %cst_8 : f32 to vector<16x14xf32>
    %32 = arith.select %30, %31, %28 : vector<16x14xi1>, vector<16x14xf32>
    %33 = arith.truncf %27 : vector<16x14xf32> to vector<16x14xbf16>
    %c0_9 = arith.constant 0 : index
    %c0_10 = arith.constant 0 : index
    %34 = vector.load %arg3[%c0_9, %c0_10] : memref<14x16xbf16, #tpu.memory_space<vmem>>, vector<14x16xbf16>
    %cst_11 = arith.constant dense<0.000000e+00> : vector<16x16xf32>
    %35 = tpu.matmul %33, %34, %cst_11 {dimension_numbers = #tpu.dot_dimension_numbers<[1], [0], [0], [1], [0, 0, 1, 1], [], []>} : vector<16x14xbf16>, vector<14x16xbf16>, vector<16x16xf32> -> vector<16x16xf32>
    %36 = arith.truncf %21 : vector<16x14xf32> to vector<16x14xbf16>
    %c0_12 = arith.constant 0 : index
    %c0_13 = arith.constant 0 : index
    %37 = vector.load %arg4[%c0_12, %c0_13] : memref<14x16xbf16, #tpu.memory_space<vmem>>, vector<14x16xbf16>
    %cst_14 = arith.constant dense<0.000000e+00> : vector<16x16xf32>
    %38 = tpu.matmul %36, %37, %cst_14 {dimension_numbers = #tpu.dot_dimension_numbers<[1], [0], [0], [1], [0, 0, 1, 1], [], []>} : vector<16x14xbf16>, vector<14x16xbf16>, vector<16x16xf32> -> vector<16x16xf32>
    %39 = arith.addf %35, %38 : vector<16x16xf32>
    %40 = arith.truncf %32 : vector<16x14xf32> to vector<16x14xbf16>
    %c0_15 = arith.constant 0 : index
    %c0_16 = arith.constant 0 : index
    %41 = vector.load %arg5[%c0_15, %c0_16] : memref<14x16xbf16, #tpu.memory_space<vmem>>, vector<14x16xbf16>
    %cst_17 = arith.constant dense<0.000000e+00> : vector<16x16xf32>
    %42 = tpu.matmul %40, %41, %cst_17 {dimension_numbers = #tpu.dot_dimension_numbers<[1], [0], [0], [1], [0, 0, 1, 1], [], []>} : vector<16x14xbf16>, vector<14x16xbf16>, vector<16x16xf32> -> vector<16x16xf32>
    %43 = arith.addf %39, %42 : vector<16x16xf32>
    %c0_18 = arith.constant 0 : index
    %c0_19 = arith.constant 0 : index
    %44 = vector.load %arg6[%c0_18, %c0_19] : memref<1x16xf32, #tpu.memory_space<vmem>>, vector<1x16xf32>
    %45 = vector.broadcast %44 : vector<1x16xf32> to vector<16x16xf32>
    %46 = arith.addf %43, %45 : vector<16x16xf32>
    %cst_20 = arith.constant 0.000000e+00 : f32
    %47 = vector.broadcast %cst_20 : f32 to vector<16x16xf32>
    %48 = arith.maximumf %46, %47 : vector<16x16xf32>
    %c1_i32_21 = arith.constant 1 : i32
    %49 = tpu.dynamic_rotate %48 by %c1_i32_21 dim 0 : vector<16x16xf32>, i32 -> vector<16x16xf32>
    %cst_22 = arith.constant 0.000000e+00 : f32
    %50 = vector.shape_cast %18 : vector<16x1xi1> to vector<16x1xi1>
    %51 = vector.broadcast %50 : vector<16x1xi1> to vector<16x16xi1>
    %52 = vector.broadcast %cst_22 : f32 to vector<16x16xf32>
    %53 = arith.select %51, %52, %49 : vector<16x16xi1>, vector<16x16xf32>
    %c15_i32_23 = arith.constant 15 : i32
    %54 = tpu.dynamic_rotate %48 by %c15_i32_23 dim 0 : vector<16x16xf32>, i32 -> vector<16x16xf32>
    %cst_24 = arith.constant 0.000000e+00 : f32
    %55 = vector.shape_cast %20 : vector<16x1xi1> to vector<16x1xi1>
    %56 = vector.broadcast %55 : vector<16x1xi1> to vector<16x16xi1>
    %57 = vector.broadcast %cst_24 : f32 to vector<16x16xf32>
    %58 = arith.select %56, %57, %54 : vector<16x16xi1>, vector<16x16xf32>
    %c1_i32_25 = arith.constant 1 : i32
    %59 = tpu.dynamic_rotate %22 by %c1_i32_25 dim 0 : vector<16x32xf32>, i32 -> vector<16x32xf32>
    %cst_26 = arith.constant 0.000000e+00 : f32
    %60 = vector.shape_cast %18 : vector<16x1xi1> to vector<16x1xi1>
    %61 = vector.broadcast %60 : vector<16x1xi1> to vector<16x32xi1>
    %62 = vector.broadcast %cst_26 : f32 to vector<16x32xf32>
    %63 = arith.select %61, %62, %59 : vector<16x32xi1>, vector<16x32xf32>
    %c15_i32_27 = arith.constant 15 : i32
    %64 = tpu.dynamic_rotate %22 by %c15_i32_27 dim 0 : vector<16x32xf32>, i32 -> vector<16x32xf32>
    %cst_28 = arith.constant 0.000000e+00 : f32
    %65 = vector.shape_cast %20 : vector<16x1xi1> to vector<16x1xi1>
    %66 = vector.broadcast %65 : vector<16x1xi1> to vector<16x32xi1>
    %67 = vector.broadcast %cst_28 : f32 to vector<16x32xf32>
    %68 = arith.select %66, %67, %64 : vector<16x32xi1>, vector<16x32xf32>
    %69 = arith.truncf %53 : vector<16x16xf32> to vector<16x16xbf16>
    %c0_29 = arith.constant 0 : index
    %c0_30 = arith.constant 0 : index
    %70 = vector.load %arg7[%c0_29, %c0_30] : memref<16x16xbf16, #tpu.memory_space<vmem>>, vector<16x16xbf16>
    %cst_31 = arith.constant dense<0.000000e+00> : vector<16x16xf32>
    %71 = tpu.matmul %69, %70, %cst_31 {dimension_numbers = #tpu.dot_dimension_numbers<[1], [0], [0], [1], [0, 0, 1, 1], [], []>} : vector<16x16xbf16>, vector<16x16xbf16>, vector<16x16xf32> -> vector<16x16xf32>
    %72 = arith.truncf %48 : vector<16x16xf32> to vector<16x16xbf16>
    %c0_32 = arith.constant 0 : index
    %c0_33 = arith.constant 0 : index
    %73 = vector.load %arg8[%c0_32, %c0_33] : memref<16x16xbf16, #tpu.memory_space<vmem>>, vector<16x16xbf16>
    %cst_34 = arith.constant dense<0.000000e+00> : vector<16x16xf32>
    %74 = tpu.matmul %72, %73, %cst_34 {dimension_numbers = #tpu.dot_dimension_numbers<[1], [0], [0], [1], [0, 0, 1, 1], [], []>} : vector<16x16xbf16>, vector<16x16xbf16>, vector<16x16xf32> -> vector<16x16xf32>
    %75 = arith.addf %71, %74 : vector<16x16xf32>
    %76 = arith.truncf %58 : vector<16x16xf32> to vector<16x16xbf16>
    %c0_35 = arith.constant 0 : index
    %c0_36 = arith.constant 0 : index
    %77 = vector.load %arg9[%c0_35, %c0_36] : memref<16x16xbf16, #tpu.memory_space<vmem>>, vector<16x16xbf16>
    %cst_37 = arith.constant dense<0.000000e+00> : vector<16x16xf32>
    %78 = tpu.matmul %76, %77, %cst_37 {dimension_numbers = #tpu.dot_dimension_numbers<[1], [0], [0], [1], [0, 0, 1, 1], [], []>} : vector<16x16xbf16>, vector<16x16xbf16>, vector<16x16xf32> -> vector<16x16xf32>
    %79 = arith.addf %75, %78 : vector<16x16xf32>
    %80 = arith.truncf %63 : vector<16x32xf32> to vector<16x32xbf16>
    %c0_38 = arith.constant 0 : index
    %c0_39 = arith.constant 0 : index
    %81 = vector.load %arg10[%c0_38, %c0_39] : memref<32x16xbf16, #tpu.memory_space<vmem>>, vector<32x16xbf16>
    %cst_40 = arith.constant dense<0.000000e+00> : vector<16x16xf32>
    %82 = tpu.matmul %80, %81, %cst_40 {dimension_numbers = #tpu.dot_dimension_numbers<[1], [0], [0], [1], [0, 0, 1, 1], [], []>} : vector<16x32xbf16>, vector<32x16xbf16>, vector<16x16xf32> -> vector<16x16xf32>
    %83 = arith.addf %79, %82 : vector<16x16xf32>
    %84 = arith.truncf %22 : vector<16x32xf32> to vector<16x32xbf16>
    %c0_41 = arith.constant 0 : index
    %c0_42 = arith.constant 0 : index
    %85 = vector.load %arg11[%c0_41, %c0_42] : memref<32x16xbf16, #tpu.memory_space<vmem>>, vector<32x16xbf16>
    %cst_43 = arith.constant dense<0.000000e+00> : vector<16x16xf32>
    %86 = tpu.matmul %84, %85, %cst_43 {dimension_numbers = #tpu.dot_dimension_numbers<[1], [0], [0], [1], [0, 0, 1, 1], [], []>} : vector<16x32xbf16>, vector<32x16xbf16>, vector<16x16xf32> -> vector<16x16xf32>
    %87 = arith.addf %83, %86 : vector<16x16xf32>
    %88 = arith.truncf %68 : vector<16x32xf32> to vector<16x32xbf16>
    %c0_44 = arith.constant 0 : index
    %c0_45 = arith.constant 0 : index
    %89 = vector.load %arg12[%c0_44, %c0_45] : memref<32x16xbf16, #tpu.memory_space<vmem>>, vector<32x16xbf16>
    %cst_46 = arith.constant dense<0.000000e+00> : vector<16x16xf32>
    %90 = tpu.matmul %88, %89, %cst_46 {dimension_numbers = #tpu.dot_dimension_numbers<[1], [0], [0], [1], [0, 0, 1, 1], [], []>} : vector<16x32xbf16>, vector<32x16xbf16>, vector<16x16xf32> -> vector<16x16xf32>
    %91 = arith.addf %87, %90 : vector<16x16xf32>
    %c0_47 = arith.constant 0 : index
    %c0_48 = arith.constant 0 : index
    %92 = vector.load %arg13[%c0_47, %c0_48] : memref<1x16xf32, #tpu.memory_space<vmem>>, vector<1x16xf32>
    %93 = vector.broadcast %92 : vector<1x16xf32> to vector<16x16xf32>
    %94 = arith.addf %91, %93 : vector<16x16xf32>
    %cst_49 = arith.constant 0.000000e+00 : f32
    %95 = vector.broadcast %cst_49 : f32 to vector<16x16xf32>
    %96 = arith.maximumf %94, %95 : vector<16x16xf32>
    %c1_i32_50 = arith.constant 1 : i32
    %97 = tpu.dynamic_rotate %96 by %c1_i32_50 dim 0 : vector<16x16xf32>, i32 -> vector<16x16xf32>
    %cst_51 = arith.constant 0.000000e+00 : f32
    %98 = vector.shape_cast %18 : vector<16x1xi1> to vector<16x1xi1>
    %99 = vector.broadcast %98 : vector<16x1xi1> to vector<16x16xi1>
    %100 = vector.broadcast %cst_51 : f32 to vector<16x16xf32>
    %101 = arith.select %99, %100, %97 : vector<16x16xi1>, vector<16x16xf32>
    %c15_i32_52 = arith.constant 15 : i32
    %102 = tpu.dynamic_rotate %96 by %c15_i32_52 dim 0 : vector<16x16xf32>, i32 -> vector<16x16xf32>
    %cst_53 = arith.constant 0.000000e+00 : f32
    %103 = vector.shape_cast %20 : vector<16x1xi1> to vector<16x1xi1>
    %104 = vector.broadcast %103 : vector<16x1xi1> to vector<16x16xi1>
    %105 = vector.broadcast %cst_53 : f32 to vector<16x16xf32>
    %106 = arith.select %104, %105, %102 : vector<16x16xi1>, vector<16x16xf32>
    %107 = arith.truncf %101 : vector<16x16xf32> to vector<16x16xbf16>
    %c0_54 = arith.constant 0 : index
    %c0_55 = arith.constant 0 : index
    %108 = vector.load %arg14[%c0_54, %c0_55] : memref<16x32xbf16, #tpu.memory_space<vmem>>, vector<16x32xbf16>
    %cst_56 = arith.constant dense<0.000000e+00> : vector<16x32xf32>
    %109 = tpu.matmul %107, %108, %cst_56 {dimension_numbers = #tpu.dot_dimension_numbers<[1], [0], [0], [1], [0, 0, 1, 1], [], []>} : vector<16x16xbf16>, vector<16x32xbf16>, vector<16x32xf32> -> vector<16x32xf32>
    %110 = arith.truncf %96 : vector<16x16xf32> to vector<16x16xbf16>
    %c0_57 = arith.constant 0 : index
    %c0_58 = arith.constant 0 : index
    %111 = vector.load %arg15[%c0_57, %c0_58] : memref<16x32xbf16, #tpu.memory_space<vmem>>, vector<16x32xbf16>
    %cst_59 = arith.constant dense<0.000000e+00> : vector<16x32xf32>
    %112 = tpu.matmul %110, %111, %cst_59 {dimension_numbers = #tpu.dot_dimension_numbers<[1], [0], [0], [1], [0, 0, 1, 1], [], []>} : vector<16x16xbf16>, vector<16x32xbf16>, vector<16x32xf32> -> vector<16x32xf32>
    %113 = arith.addf %109, %112 : vector<16x32xf32>
    %114 = arith.truncf %106 : vector<16x16xf32> to vector<16x16xbf16>
    %c0_60 = arith.constant 0 : index
    %c0_61 = arith.constant 0 : index
    %115 = vector.load %arg16[%c0_60, %c0_61] : memref<16x32xbf16, #tpu.memory_space<vmem>>, vector<16x32xbf16>
    %cst_62 = arith.constant dense<0.000000e+00> : vector<16x32xf32>
    %116 = tpu.matmul %114, %115, %cst_62 {dimension_numbers = #tpu.dot_dimension_numbers<[1], [0], [0], [1], [0, 0, 1, 1], [], []>} : vector<16x16xbf16>, vector<16x32xbf16>, vector<16x32xf32> -> vector<16x32xf32>
    %117 = arith.addf %113, %116 : vector<16x32xf32>
    %c0_63 = arith.constant 0 : index
    %c0_64 = arith.constant 0 : index
    %118 = vector.load %arg17[%c0_63, %c0_64] : memref<1x32xf32, #tpu.memory_space<vmem>>, vector<1x32xf32>
    %119 = vector.broadcast %118 : vector<1x32xf32> to vector<16x32xf32>
    %120 = arith.addf %117, %119 : vector<16x32xf32>
    %cst_65 = arith.constant 0.000000e+00 : f32
    %121 = vector.broadcast %cst_65 : f32 to vector<16x32xf32>
    %122 = arith.maximumf %120, %121 : vector<16x32xf32>
    %c1_i32_66 = arith.constant 1 : i32
    %123 = tpu.dynamic_rotate %122 by %c1_i32_66 dim 0 : vector<16x32xf32>, i32 -> vector<16x32xf32>
    %cst_67 = arith.constant 0.000000e+00 : f32
    %124 = vector.shape_cast %18 : vector<16x1xi1> to vector<16x1xi1>
    %125 = vector.broadcast %124 : vector<16x1xi1> to vector<16x32xi1>
    %126 = vector.broadcast %cst_67 : f32 to vector<16x32xf32>
    %127 = arith.select %125, %126, %123 : vector<16x32xi1>, vector<16x32xf32>
    %c15_i32_68 = arith.constant 15 : i32
    %128 = tpu.dynamic_rotate %122 by %c15_i32_68 dim 0 : vector<16x32xf32>, i32 -> vector<16x32xf32>
    %cst_69 = arith.constant 0.000000e+00 : f32
    %129 = vector.shape_cast %20 : vector<16x1xi1> to vector<16x1xi1>
    %130 = vector.broadcast %129 : vector<16x1xi1> to vector<16x32xi1>
    %131 = vector.broadcast %cst_69 : f32 to vector<16x32xf32>
    %132 = arith.select %130, %131, %128 : vector<16x32xi1>, vector<16x32xf32>
    %133 = arith.truncf %127 : vector<16x32xf32> to vector<16x32xbf16>
    %c0_70 = arith.constant 0 : index
    %c0_71 = arith.constant 0 : index
    %134 = vector.load %arg18[%c0_70, %c0_71] : memref<32x64xbf16, #tpu.memory_space<vmem>>, vector<32x64xbf16>
    %cst_72 = arith.constant dense<0.000000e+00> : vector<16x64xf32>
    %135 = tpu.matmul %133, %134, %cst_72 {dimension_numbers = #tpu.dot_dimension_numbers<[1], [0], [0], [1], [0, 0, 1, 1], [], []>} : vector<16x32xbf16>, vector<32x64xbf16>, vector<16x64xf32> -> vector<16x64xf32>
    %136 = arith.truncf %122 : vector<16x32xf32> to vector<16x32xbf16>
    %c0_73 = arith.constant 0 : index
    %c0_74 = arith.constant 0 : index
    %137 = vector.load %arg19[%c0_73, %c0_74] : memref<32x64xbf16, #tpu.memory_space<vmem>>, vector<32x64xbf16>
    %cst_75 = arith.constant dense<0.000000e+00> : vector<16x64xf32>
    %138 = tpu.matmul %136, %137, %cst_75 {dimension_numbers = #tpu.dot_dimension_numbers<[1], [0], [0], [1], [0, 0, 1, 1], [], []>} : vector<16x32xbf16>, vector<32x64xbf16>, vector<16x64xf32> -> vector<16x64xf32>
    %139 = arith.addf %135, %138 : vector<16x64xf32>
    %140 = arith.truncf %132 : vector<16x32xf32> to vector<16x32xbf16>
    %c0_76 = arith.constant 0 : index
    %c0_77 = arith.constant 0 : index
    %141 = vector.load %arg20[%c0_76, %c0_77] : memref<32x64xbf16, #tpu.memory_space<vmem>>, vector<32x64xbf16>
    %cst_78 = arith.constant dense<0.000000e+00> : vector<16x64xf32>
    %142 = tpu.matmul %140, %141, %cst_78 {dimension_numbers = #tpu.dot_dimension_numbers<[1], [0], [0], [1], [0, 0, 1, 1], [], []>} : vector<16x32xbf16>, vector<32x64xbf16>, vector<16x64xf32> -> vector<16x64xf32>
    %143 = arith.addf %139, %142 : vector<16x64xf32>
    %c0_79 = arith.constant 0 : index
    %c0_80 = arith.constant 0 : index
    %144 = vector.load %arg21[%c0_79, %c0_80] : memref<1x64xf32, #tpu.memory_space<vmem>>, vector<1x64xf32>
    %145 = vector.broadcast %144 : vector<1x64xf32> to vector<16x64xf32>
    %146 = arith.addf %143, %145 : vector<16x64xf32>
    %cst_81 = arith.constant 0.000000e+00 : f32
    %147 = vector.broadcast %cst_81 : f32 to vector<16x64xf32>
    %148 = arith.maximumf %146, %147 : vector<16x64xf32>
    %c1_i32_82 = arith.constant 1 : i32
    %149 = tpu.dynamic_rotate %148 by %c1_i32_82 dim 0 : vector<16x64xf32>, i32 -> vector<16x64xf32>
    %cst_83 = arith.constant 0.000000e+00 : f32
    %150 = vector.shape_cast %18 : vector<16x1xi1> to vector<16x1xi1>
    %151 = vector.broadcast %150 : vector<16x1xi1> to vector<16x64xi1>
    %152 = vector.broadcast %cst_83 : f32 to vector<16x64xf32>
    %153 = arith.select %151, %152, %149 : vector<16x64xi1>, vector<16x64xf32>
    %c15_i32_84 = arith.constant 15 : i32
    %154 = tpu.dynamic_rotate %148 by %c15_i32_84 dim 0 : vector<16x64xf32>, i32 -> vector<16x64xf32>
    %cst_85 = arith.constant 0.000000e+00 : f32
    %155 = vector.shape_cast %20 : vector<16x1xi1> to vector<16x1xi1>
    %156 = vector.broadcast %155 : vector<16x1xi1> to vector<16x64xi1>
    %157 = vector.broadcast %cst_85 : f32 to vector<16x64xf32>
    %158 = arith.select %156, %157, %154 : vector<16x64xi1>, vector<16x64xf32>
    %159 = arith.truncf %153 : vector<16x64xf32> to vector<16x64xbf16>
    %c0_86 = arith.constant 0 : index
    %c0_87 = arith.constant 0 : index
    %160 = vector.load %arg22[%c0_86, %c0_87] : memref<64x128xbf16, #tpu.memory_space<vmem>>, vector<64x128xbf16>
    %cst_88 = arith.constant dense<0.000000e+00> : vector<16x128xf32>
    %161 = tpu.matmul %159, %160, %cst_88 {dimension_numbers = #tpu.dot_dimension_numbers<[1], [0], [0], [1], [0, 0, 1, 1], [], []>} : vector<16x64xbf16>, vector<64x128xbf16>, vector<16x128xf32> -> vector<16x128xf32>
    %162 = arith.truncf %148 : vector<16x64xf32> to vector<16x64xbf16>
    %c0_89 = arith.constant 0 : index
    %c0_90 = arith.constant 0 : index
    %163 = vector.load %arg23[%c0_89, %c0_90] : memref<64x128xbf16, #tpu.memory_space<vmem>>, vector<64x128xbf16>
    %cst_91 = arith.constant dense<0.000000e+00> : vector<16x128xf32>
    %164 = tpu.matmul %162, %163, %cst_91 {dimension_numbers = #tpu.dot_dimension_numbers<[1], [0], [0], [1], [0, 0, 1, 1], [], []>} : vector<16x64xbf16>, vector<64x128xbf16>, vector<16x128xf32> -> vector<16x128xf32>
    %165 = arith.addf %161, %164 : vector<16x128xf32>
    %166 = arith.truncf %158 : vector<16x64xf32> to vector<16x64xbf16>
    %c0_92 = arith.constant 0 : index
    %c0_93 = arith.constant 0 : index
    %167 = vector.load %arg24[%c0_92, %c0_93] : memref<64x128xbf16, #tpu.memory_space<vmem>>, vector<64x128xbf16>
    %cst_94 = arith.constant dense<0.000000e+00> : vector<16x128xf32>
    %168 = tpu.matmul %166, %167, %cst_94 {dimension_numbers = #tpu.dot_dimension_numbers<[1], [0], [0], [1], [0, 0, 1, 1], [], []>} : vector<16x64xbf16>, vector<64x128xbf16>, vector<16x128xf32> -> vector<16x128xf32>
    %169 = arith.addf %165, %168 : vector<16x128xf32>
    %c0_95 = arith.constant 0 : index
    %c0_96 = arith.constant 0 : index
    %170 = vector.load %arg25[%c0_95, %c0_96] : memref<1x128xf32, #tpu.memory_space<vmem>>, vector<1x128xf32>
    %171 = vector.broadcast %170 : vector<1x128xf32> to vector<16x128xf32>
    %172 = arith.addf %169, %171 : vector<16x128xf32>
    %cst_97 = arith.constant 0.000000e+00 : f32
    %173 = vector.broadcast %cst_97 : f32 to vector<16x128xf32>
    %174 = arith.maximumf %172, %173 : vector<16x128xf32>
    %175 = arith.truncf %174 : vector<16x128xf32> to vector<16x128xbf16>
    %c0_98 = arith.constant 0 : index
    %c0_99 = arith.constant 0 : index
    %176 = vector.load %arg26[%c0_98, %c0_99] : memref<128x16xbf16, #tpu.memory_space<vmem>>, vector<128x16xbf16>
    %cst_100 = arith.constant dense<0.000000e+00> : vector<16x16xf32>
    %177 = tpu.matmul %175, %176, %cst_100 {dimension_numbers = #tpu.dot_dimension_numbers<[1], [0], [0], [1], [0, 0, 1, 1], [], []>} : vector<16x128xbf16>, vector<128x16xbf16>, vector<16x16xf32> -> vector<16x16xf32>
    %c0_101 = arith.constant 0 : index
    %c0_102 = arith.constant 0 : index
    %178 = vector.load %arg27[%c0_101, %c0_102] : memref<1x16xf32, #tpu.memory_space<vmem>>, vector<1x16xf32>
    %179 = vector.broadcast %178 : vector<1x16xf32> to vector<16x16xf32>
    %180 = arith.addf %177, %179 : vector<16x16xf32>
    %cst_103 = arith.constant 0.000000e+00 : f32
    %181 = vector.broadcast %cst_103 : f32 to vector<16x16xf32>
    %182 = arith.maximumf %180, %181 : vector<16x16xf32>
    %183 = arith.truncf %182 : vector<16x16xf32> to vector<16x16xbf16>
    %c0_104 = arith.constant 0 : index
    %c0_105 = arith.constant 0 : index
    %184 = vector.load %arg28[%c0_104, %c0_105] : memref<16x2xbf16, #tpu.memory_space<vmem>>, vector<16x2xbf16>
    %cst_106 = arith.constant dense<0.000000e+00> : vector<16x2xf32>
    %185 = tpu.matmul %183, %184, %cst_106 {dimension_numbers = #tpu.dot_dimension_numbers<[1], [0], [0], [1], [0, 0, 1, 1], [], []>} : vector<16x16xbf16>, vector<16x2xbf16>, vector<16x2xf32> -> vector<16x2xf32>
    %c0_107 = arith.constant 0 : index
    %c0_108 = arith.constant 0 : index
    %186 = vector.load %arg29[%c0_107, %c0_108] : memref<1x2xf32, #tpu.memory_space<vmem>>, vector<1x2xf32>
    %187 = vector.broadcast %186 : vector<1x2xf32> to vector<16x2xf32>
    %188 = arith.addf %185, %187 : vector<16x2xf32>
    %c0_109 = arith.constant 0 : index
    %c0_110 = arith.constant 0 : index
    %189 = vector.load %arg30[%c0_109, %c0_110] : memref<16x2xf32, #tpu.memory_space<vmem>>, vector<16x2xf32>
    tpu.vector_store %arg30[%c0_109, %c0_110], %188 {strides = array<i32>} : memref<16x2xf32, #tpu.memory_space<vmem>>, vector<16x2xf32>,
    return
  }
  func.func @transform_0(%arg0: i32) -> (i32, i32) {
    %c0_i32 = arith.constant 0 : i32
    %c0_i32_0 = arith.constant 0 : i32
    return %arg0, %c0_i32 : i32, i32
  }
  func.func @transform_1(%arg0: i32) -> (i32, i32) {
    %c0_i32 = arith.constant 0 : i32
    %c0_i32_0 = arith.constant 0 : i32
    return %arg0, %c0_i32 : i32, i32
  }
  func.func @transform_2(%arg0: i32) -> (i32, i32) {
    %c0_i32 = arith.constant 0 : i32
    %c0_i32_0 = arith.constant 0 : i32
    %c0_i32_1 = arith.constant 0 : i32
    return %c0_i32, %c0_i32_0 : i32, i32
  }
  func.func @transform_3(%arg0: i32) -> (i32, i32) {
    %c0_i32 = arith.constant 0 : i32
    %c0_i32_0 = arith.constant 0 : i32
    %c0_i32_1 = arith.constant 0 : i32
    return %c0_i32, %c0_i32_0 : i32, i32
  }
  func.func @transform_4(%arg0: i32) -> (i32, i32) {
    %c0_i32 = arith.constant 0 : i32
    %c0_i32_0 = arith.constant 0 : i32
    %c0_i32_1 = arith.constant 0 : i32
    return %c0_i32, %c0_i32_0 : i32, i32
  }
  func.func @transform_5(%arg0: i32) -> (i32, i32) {
    %c0_i32 = arith.constant 0 : i32
    %c0_i32_0 = arith.constant 0 : i32
    %c0_i32_1 = arith.constant 0 : i32
    return %c0_i32, %c0_i32_0 : i32, i32
  }
  func.func @transform_6(%arg0: i32) -> (i32, i32) {
    %c0_i32 = arith.constant 0 : i32
    %c0_i32_0 = arith.constant 0 : i32
    %c0_i32_1 = arith.constant 0 : i32
    return %c0_i32, %c0_i32_0 : i32, i32
  }
  func.func @transform_7(%arg0: i32) -> (i32, i32) {
    %c0_i32 = arith.constant 0 : i32
    %c0_i32_0 = arith.constant 0 : i32
    %c0_i32_1 = arith.constant 0 : i32
    return %c0_i32, %c0_i32_0 : i32, i32
  }
  func.func @transform_8(%arg0: i32) -> (i32, i32) {
    %c0_i32 = arith.constant 0 : i32
    %c0_i32_0 = arith.constant 0 : i32
    %c0_i32_1 = arith.constant 0 : i32
    return %c0_i32, %c0_i32_0 : i32, i32
  }
  func.func @transform_9(%arg0: i32) -> (i32, i32) {
    %c0_i32 = arith.constant 0 : i32
    %c0_i32_0 = arith.constant 0 : i32
    %c0_i32_1 = arith.constant 0 : i32
    return %c0_i32, %c0_i32_0 : i32, i32
  }
  func.func @transform_10(%arg0: i32) -> (i32, i32) {
    %c0_i32 = arith.constant 0 : i32
    %c0_i32_0 = arith.constant 0 : i32
    %c0_i32_1 = arith.constant 0 : i32
    return %c0_i32, %c0_i32_0 : i32, i32
  }
  func.func @transform_11(%arg0: i32) -> (i32, i32) {
    %c0_i32 = arith.constant 0 : i32
    %c0_i32_0 = arith.constant 0 : i32
    %c0_i32_1 = arith.constant 0 : i32
    return %c0_i32, %c0_i32_0 : i32, i32
  }
  func.func @transform_12(%arg0: i32) -> (i32, i32) {
    %c0_i32 = arith.constant 0 : i32
    %c0_i32_0 = arith.constant 0 : i32
    %c0_i32_1 = arith.constant 0 : i32
    return %c0_i32, %c0_i32_0 : i32, i32
  }
  func.func @transform_13(%arg0: i32) -> (i32, i32) {
    %c0_i32 = arith.constant 0 : i32
    %c0_i32_0 = arith.constant 0 : i32
    %c0_i32_1 = arith.constant 0 : i32
    return %c0_i32, %c0_i32_0 : i32, i32
  }
  func.func @transform_14(%arg0: i32) -> (i32, i32) {
    %c0_i32 = arith.constant 0 : i32
    %c0_i32_0 = arith.constant 0 : i32
    %c0_i32_1 = arith.constant 0 : i32
    return %c0_i32, %c0_i32_0 : i32, i32
  }
  func.func @transform_15(%arg0: i32) -> (i32, i32) {
    %c0_i32 = arith.constant 0 : i32
    %c0_i32_0 = arith.constant 0 : i32
    %c0_i32_1 = arith.constant 0 : i32
    return %c0_i32, %c0_i32_0 : i32, i32
  }
  func.func @transform_16(%arg0: i32) -> (i32, i32) {
    %c0_i32 = arith.constant 0 : i32
    %c0_i32_0 = arith.constant 0 : i32
    %c0_i32_1 = arith.constant 0 : i32
    return %c0_i32, %c0_i32_0 : i32, i32
  }
  func.func @transform_17(%arg0: i32) -> (i32, i32) {
    %c0_i32 = arith.constant 0 : i32
    %c0_i32_0 = arith.constant 0 : i32
    %c0_i32_1 = arith.constant 0 : i32
    return %c0_i32, %c0_i32_0 : i32, i32
  }
  func.func @transform_18(%arg0: i32) -> (i32, i32) {
    %c0_i32 = arith.constant 0 : i32
    %c0_i32_0 = arith.constant 0 : i32
    %c0_i32_1 = arith.constant 0 : i32
    return %c0_i32, %c0_i32_0 : i32, i32
  }
  func.func @transform_19(%arg0: i32) -> (i32, i32) {
    %c0_i32 = arith.constant 0 : i32
    %c0_i32_0 = arith.constant 0 : i32
    %c0_i32_1 = arith.constant 0 : i32
    return %c0_i32, %c0_i32_0 : i32, i32
  }
  func.func @transform_20(%arg0: i32) -> (i32, i32) {
    %c0_i32 = arith.constant 0 : i32
    %c0_i32_0 = arith.constant 0 : i32
    %c0_i32_1 = arith.constant 0 : i32
    return %c0_i32, %c0_i32_0 : i32, i32
  }
  func.func @transform_21(%arg0: i32) -> (i32, i32) {
    %c0_i32 = arith.constant 0 : i32
    %c0_i32_0 = arith.constant 0 : i32
    %c0_i32_1 = arith.constant 0 : i32
    return %c0_i32, %c0_i32_0 : i32, i32
  }
  func.func @transform_22(%arg0: i32) -> (i32, i32) {
    %c0_i32 = arith.constant 0 : i32
    %c0_i32_0 = arith.constant 0 : i32
    %c0_i32_1 = arith.constant 0 : i32
    return %c0_i32, %c0_i32_0 : i32, i32
  }
  func.func @transform_23(%arg0: i32) -> (i32, i32) {
    %c0_i32 = arith.constant 0 : i32
    %c0_i32_0 = arith.constant 0 : i32
    %c0_i32_1 = arith.constant 0 : i32
    return %c0_i32, %c0_i32_0 : i32, i32
  }
  func.func @transform_24(%arg0: i32) -> (i32, i32) {
    %c0_i32 = arith.constant 0 : i32
    %c0_i32_0 = arith.constant 0 : i32
    %c0_i32_1 = arith.constant 0 : i32
    return %c0_i32, %c0_i32_0 : i32, i32
  }
  func.func @transform_25(%arg0: i32) -> (i32, i32) {
    %c0_i32 = arith.constant 0 : i32
    %c0_i32_0 = arith.constant 0 : i32
    %c0_i32_1 = arith.constant 0 : i32
    return %c0_i32, %c0_i32_0 : i32, i32
  }
  func.func @transform_26(%arg0: i32) -> (i32, i32) {
    %c0_i32 = arith.constant 0 : i32
    %c0_i32_0 = arith.constant 0 : i32
    %c0_i32_1 = arith.constant 0 : i32
    return %c0_i32, %c0_i32_0 : i32, i32
  }
  func.func @transform_27(%arg0: i32) -> (i32, i32) {
    %c0_i32 = arith.constant 0 : i32
    %c0_i32_0 = arith.constant 0 : i32
    %c0_i32_1 = arith.constant 0 : i32
    return %c0_i32, %c0_i32_0 : i32, i32
  }
  func.func @transform_28(%arg0: i32) -> (i32, i32) {
    %c0_i32 = arith.constant 0 : i32
    %c0_i32_0 = arith.constant 0 : i32
    %c0_i32_1 = arith.constant 0 : i32
    return %c0_i32, %c0_i32_0 : i32, i32
  }
  func.func @transform_29(%arg0: i32) -> (i32, i32) {
    %c0_i32 = arith.constant 0 : i32
    %c0_i32_0 = arith.constant 0 : i32
    return %arg0, %c0_i32 : i32, i32
  }
}

</mosaic_0001>

<bundles_post_ra>
// kernel: tweet_sentiment_cnn_forward.1
= control target key start
LH: loop header
LB: loop body
LE: loop exit
PB: predicated region body
PF: predicated region fallthrough
CT: control target
= control target key end

     0   :  { %v1974_v0 = vmov 0.0   ;;  %s1975_s3 = smov 3   ;;  %vm1976_vm0 = vmmov 0   ;;  %v123_v1 = vlaneseq  ;;  %s1977_s10 = smov 2   ;;  %vm195_vm1 = vcmask 1046528   ;;  %s2360_s0 = inlined_call_operand.smem [shape: u32[30], index: -1, kind: input, shape index: {}] }
   0x1   :  { %1737 = vmatprep.subr.bf16.mxu1 %v1974_v0  ;;  %s1580_s6 = sld [smem:[%s2360_s0 + %s1975_s3]]   ;;  %1739 = vmatprep.mubr.msk.bf16.mxu1 %vm1976_vm0, %v1974_v0  ;;  %s1978_s14 = smov 4   ;;  %vm191_vm2 = vcmask 113664   ;;  %vm396_vm9 = vcmask 130048   ;;  %vm563_vm10 = vcmask 261120   ;;  %vm1193_vm11 = vcmask 523264  }
   0x2   :  { %s1_s9 = sld [smem:[%s2360_s0]]   ;;  %1749 = vmatprep.subr.bf16.mxu0 %v1974_v0  ;;  %1751 = vmatprep.mubr.msk.bf16.mxu0 %vm1976_vm0, %v1974_v0  ;;  %v2028_v2 = vshrl.u32 %v123_v1, 7  ;;  %s1979_s18 = smov 7   ;;  %vm1571_vm12 = vcmask 15360  }
   0x3   :  { %s1579_s13 = sld [smem:[%s2360_s0 + %s1977_s10]]   ;;  %s1980_s22 = smov 6  }
   0x4   :  { %s1581_s17 = sld [smem:[%s2360_s0 + %s1978_s14]]   ;;  %v125_v3 = vadd.s32 8, %v2028_v2  ;;  %v130_v4 = vand.u32 7, %v2028_v2  ;;  %vm160_vm3 = vcmp.lt.s32.totalorder %v2028_v2, 1  ;;  %vm171_vm4 = vcmp.lt.s32.totalorder %v2028_v2, 7  ;;  %s1981_s26 = smov 8  }
   0x5   :  { %s1584_s21 = sld [smem:[%s2360_s0 + %s1979_s18]]   ;;  %s1982_s30 = smov 9  }
   0x6   :  { %v137_v8 = vand.u32 7, %v125_v3  ;;  %vm2034_vm5 = vcmp.eq.s32.totalorder %v130_v4, 0  ;;  %vm2048_vm7 = vcmp.eq.s32.totalorder %v130_v4, 7  ;;  %s1583_s25 = sld [smem:[%s2360_s0 + %s1980_s22]]   ;;  %s1983_s4 = smov 10  }
   0x7   :  { %v1932_v5 = vld [vmem:[%s1580_s6] sm:$0x7f]   ;;  %s2090_s29 = sld [smem:[%s2360_s0 + %s1981_s26]]   ;;  %s1984_s8 = smov 11  }
   0x8   :  { %v154_v6 = vld [vmem:[%s1_s9] sm:$0xff]  ;;  %v155_v7 = vld [vmem:[%s1_s9 + $0x8] sm:$0xff]  ;;  %v197_v10 = vsel %vm195_vm1, %v1932_v5, 0  ;;  %vm2039_vm6 = vcmp.eq.s32.totalorder %v137_v8, 0  ;;  %vm2052_vm8 = vcmp.eq.s32.totalorder %v137_v8, 7  ;;  %s2096_s3 = sld [smem:[%s2360_s0 + %s1982_s30]]   ;;  %s1985_s12 = smov 5  }
   0x9   :  { %v158_v11 = vrot.slane %v154_v6, 7  ;;  %v159_v12 = vrot.slane %v155_v7, 7  ;;  %v169_v13 = vrot.slane %v154_v6, 1  ;;  %1738 = vmatpush3.bf16.msra.mxu1 %v197_v10  ;;  %v170_v14 = vrot.slane %v155_v7, 1  ;;  %v1933_v16 = vld [vmem:[%s1579_s13] sm:$0x7f]   ;;  %s2101_s7 = sld [smem:[%s2360_s0 + %s1983_s4]]  }
   0xa   :  { %v183_v15 = vpack.c.bf16 %v155_v7, %v154_v6  ;;  %1743 = vmatprep.subr.bf16.mxu1 %v1974_v0  ;;  %v1934_v18 = vld [vmem:[%s1581_s17] sm:$0x7f]   ;;  %v249_v23 = vsel %vm195_vm1, %v1933_v16, 0  ;;  %s2107_s11 = sld [smem:[%s2360_s0 + %s1984_s8]]   ;;  %s1986_s16 = smov 1  }
   0xb   :  { %v161_v19 = vsel %vm160_vm3, %v158_v11, %v159_v12  ;;  %v162_v20 = vsel %vm160_vm3, %v159_v12, %v158_v11  ;;  %v172_v24 = vsel %vm171_vm4, %v169_v13, %v170_v14  ;;  %v304_v25 = vsel %vm195_vm1, %v1934_v18, 0  ;;  %v1935_v33 = vld [vmem:[%s1584_s21] sm:$0xff]   ;;  %s1582_s15 = sld [smem:[%s2360_s0 + %s1985_s12]]   ;;  %s1987_s20 = smov 14  }
   0xc   :  { %1740 = vmatmul.mubr.msk.bf16.vlgmr.msra.gmra.mrb[0].mxu1 %vm191_vm2, %v183_v15  ;;  %v173_v26 = vsel %vm171_vm4, %v170_v14, %v169_v13  ;;  %v178_v27 = vsel %vm2048_vm7, 0.0, %v172_v24  ;;  %1750 = vmatpush3.bf16.msra.mxu0 %v304_v25  ;;  %v167_v28 = vsel %vm2034_vm5, 0.0, %v162_v20  ;;  %v168_v29 = vsel %vm2039_vm6, 0.0, %v161_v19  ;;  %v1936_v34 = vld [vmem:[%s1583_s25] sm:$0xff]   ;;  %s1578_s19 = sld [smem:[%s2360_s0 + %s1986_s16]]   ;;  %s1988_s24 = smov 13  }
   0xd   :  { %1744 = vmatpush3.bf16.msra.mxu1 %v249_v23  ;;  %v179_v30 = vsel %vm2052_vm8, 0.0, %v173_v26  ;;  %1745 = vmatprep.mubr.msk.bf16.mxu1 %vm1976_vm0, %v1974_v0  ;;  %v180_v32 = vpack.c.bf16 %v168_v29, %v167_v28  ;;  %v1937_v59 = vld [vmem:[%s2090_s29] sm:$0xff]   ;;  %s1591_s23 = sld [smem:[%s2360_s0 + %s1987_s20]]   ;;  %s1989_s28 = smov 15  }
   0xe   :  { %v292_v31 = vpack.c.bf16 %v179_v30, %v178_v27  ;;  %1755 = vmatprep.subr.bf16.mxu1 %v1974_v0  ;;  %1761 = vmatprep.subr.bf16.mxu0 %v1974_v0  ;;  %v1938_v11 = vld [vmem:[%s2096_s3] sm:$0xff]   ;;  %v1939_v19 = vld [vmem:[%s2096_s3 + $0x8] sm:$0xff]   ;;  %s1590_s27 = sld [smem:[%s2360_s0 + %s1988_s24]]   ;;  %s1990_s2 = smov 12  }
   0xf   :  { %v1940_v20 = vld [vmem:[%s2101_s7] sm:$0xff]   ;;  %v1941_v28 = vld [vmem:[%s2101_s7 + $0x8] sm:$0xff]   ;;  %s2188_s1 = sld [smem:[%s2360_s0 + %s1989_s28]]   ;;  %s1991_s6 = smov 18  }
  0x10   :  { %1752 = vmatmul.mubr.msk.bf16.vlgmr.msra.gmra.mrb[0].mxu0 %vm191_vm2, %v292_v31  ;;  %v1942_v29 = vld [vmem:[%s2107_s11] sm:$0xff]   ;;  %s1589_s5 = sld [smem:[%s2360_s0 + %s1990_s2]]   ;;  %s1992_s10 = smov 17  }
  0x11   :  { %1763 = vmatprep.mubr.msk.bf16.mxu0 %vm1976_vm0, %v1974_v0  ;;  %1762 = vmatpush3.bf16.msra.mxu0 %v1936_v34  ;;  %v1613_v46 = vld [vmem:[%s1582_s15] ss:$0 sm:$0xff]  ;;  %s1595_s9 = sld [smem:[%s2360_s0 + %s1991_s6]]   ;;  %s1993_s14 = smov 19  }
  0x12   :  { %1773 = vmatprep.subr.bf16.mxu0 %v1974_v0  ;;  %v156_v55 = vld [vmem:[%s1578_s19] sm:$0xff]  ;;  %v157_v56 = vld [vmem:[%s1578_s19 + $0x8] sm:$0xff]  ;;  %s1594_s13 = sld [smem:[%s2360_s0 + %s1992_s10]]   ;;  %s1994_s18 = smov 16  }
  0x13   :  { %v372_v60 = vrot.slane %v156_v55, 7  ;;  %v373_v61 = vrot.slane %v157_v56, 7  ;;  %v378_v25 = vrot.slane %v156_v55, 1  ;;  %v379_v26 = vrot.slane %v157_v56, 1  ;;  %s2231_s17 = sld [smem:[%s2360_s0 + %s1993_s14]]   ;;  %s1995_s22 = smov 22  }
  0x14   :  { %1746 = vmatmul.mubr.msk.bf16.vlgmr.msra.gmra.mrb[4].mxu1 %vm191_vm2, %v180_v32  ;;  %v610_v32 = vpack.c.bf16 %v157_v56, %v156_v55  ;;  %s1593_s21 = sld [smem:[%s2360_s0 + %s1994_s18]]   ;;  %s1996_s26 = smov 21  }
  0x15   :  { %1757 = vmatprep.mubr.msk.bf16.mxu1 %vm1976_vm0, %v1974_v0  ;;  %1756 = vmatpush3.bf16.msra.mxu1 %v1935_v33  ;;  %v374_v16 = vsel %vm160_vm3, %v372_v60, %v373_v61  ;;  %v375_v18 = vsel %vm160_vm3, %v373_v61, %v372_v60  ;;  %v380_v30 = vsel %vm171_vm4, %v378_v25, %v379_v26  ;;  %v1943_v33 = vld [vmem:[%s2107_s11 + $0x8] sm:$0xff]   ;;  %s1599_s25 = sld [smem:[%s2360_s0 + %s1995_s22]]   ;;  %s1997_s30 = smov 23  }
  0x16   :  { %1767 = vmatprep.subr.bf16.mxu1 %v1974_v0  ;;  %v376_v23 = vsel %vm2034_vm5, 0.0, %v375_v18  ;;  %v377_v24 = vsel %vm2039_vm6, 0.0, %v374_v16  ;;  %v381_v31 = vsel %vm171_vm4, %v379_v26, %v378_v25  ;;  %v382_v34 = vsel %vm2048_vm7, 0.0, %v380_v30  ;;  %s1598_s29 = sld [smem:[%s2360_s0 + %s1996_s26]]   ;;  %s1998_s4 = smov 25  }
  0x17   :  { %v546_v27 = vpack.c.bf16 %v377_v24, %v376_v23  ;;  %s2281_s3 = sld [smem:[%s2360_s0 + %s1997_s30]]   ;;  %s1999_s8 = smov 20  }
  0x18   :  { %s2291_s7 = sld [smem:[%s2360_s0 + %s1998_s4]]   ;;  %s2000_s12 = smov 24  }
  0x19   :  { %s1597_s11 = sld [smem:[%s2360_s0 + %s1999_s8]]   ;;  %s2001_s16 = smov 27  }
  0x1a   :  { %s1601_s15 = sld [smem:[%s2360_s0 + %s2000_s12]]   ;;  %s2002_s20 = smov 26  }
  0x1b   :  { %s1604_s19 = sld [smem:[%s2360_s0 + %s2001_s16]]   ;;  %s2003_s24 = smov 28  }
  0x1c   :  { %s2004_s28 = smov 29  }
  0x1d   :  { %v1963_v17 = vld [vmem:[%s2281_s3 + $0x10] sm:$0xff]   ;;  %v1964_v21 = vld [vmem:[%s2281_s3 + $0x18] sm:$0xff]  }
  0x1e   :  { %v1967_v22 = vld [vmem:[%s2291_s7 + $0x10] sm:$0xff]  }
  0xdf   :  { %v233_v35 = vpop.f32.mrb[0].mxu1 }
  0xe0   :  { %v1741_v36 = vpop.f32.mrb[1].mxu1 }
  0xe1   :  { %v236_v37 = vpop.f32.mrb[2].mxu1 }
  0xe2   :  { %v1742_v38 = vpop.f32.mrb[3].mxu1 }
  0xe3   :  { %v340_v39 = vpop.f32.mrb[0].mxu0  ;;  %v1945_v38 = vld [vmem:[%s1590_s27] sm:$0xff]   ;;  %s1605_s27 = sld [smem:[%s2360_s0 + %s2003_s24]]  }
  0xe4   :  { %v1753_v40 = vpop.f32.mrb[1].mxu0 }
  0xe5   :  { %v343_v41 = vpop.f32.mrb[2].mxu0 }
  0xe6   :  { %v1754_v42 = vpop.f32.mrb[3].mxu0 }
  0xe7   :  { %v285_v43 = vpop.f32.mrb[4].mxu1 }
  0xe8   :  { %v286_v44 = vadd.f32 %v285_v43, %v233_v35  ;;  %v1747_v45 = vpop.f32.mrb[5].mxu1  ;;  %v383_v35 = vsel %vm2052_vm8, 0.0, %v381_v31 }
  0xe9   :  { %v288_v47 = vpop.f32.mrb[6].mxu1  ;;  %v673_v36 = vpack.c.bf16 %v383_v35, %v382_v34 }
  0xea   :  { %v347_v48 = vadd.f32 %v340_v39, %v286_v44  ;;  %v289_v49 = vadd.f32 %v288_v47, %v236_v37  ;;  %v1748_v50 = vpop.f32.mrb[7].mxu1  ;;  %v1944_v37 = vld [vmem:[%s1591_s23] sm:$0xff]   ;;  %s1603_s23 = sld [smem:[%s2360_s0 + %s2002_s20]]  }
  0xec   :  { %v356_v51 = vadd.f32 %v1613_v46, %v347_v48  ;;  %v348_v52 = vadd.f32 %v343_v41, %v289_v49 }
  0xee   :  { %v358_v53 = vmax.f32 %v356_v51, 0.0  ;;  %v357_v54 = vadd.f32 %v1613_v46, %v348_v52 }
  0xf0   :  { %v359_v57 = vmax.f32 %v357_v54, 0.0  ;;  %v360_v58 = vrot.slane %v358_v53, 7  ;;  %v366_v62 = vrot.slane %v358_v53, 1 }
  0xf2   :  { %v361_v63 = vrot.slane %v359_v57, 7  ;;  %v367_v1 = vrot.slane %v359_v57, 1  ;;  %v387_v3 = vpack.c.bf16 %v359_v57, %v358_v53 }
  0xf4   :  { %v362_v4 = vsel %vm160_vm3, %v360_v58, %v361_v63  ;;  %v363_v5 = vsel %vm160_vm3, %v361_v63, %v360_v58  ;;  %v368_v6 = vsel %vm171_vm4, %v366_v62, %v367_v1  ;;  %v369_v7 = vsel %vm171_vm4, %v367_v1, %v366_v62  ;;  %1758 = vmatmul.mubr.msk.bf16.vlgmr.msra.gmra.mrb[8].mxu1 %vm396_vm9, %v387_v3 }
  0xf5   :  { %1768 = vmatpush3.bf16.msra.mxu1 %v1937_v59  ;;  %v364_v8 = vsel %vm2034_vm5, 0.0, %v363_v5  ;;  %v365_v10 = vsel %vm2039_vm6, 0.0, %v362_v4  ;;  %1769 = vmatprep.mubr.msk.bf16.mxu1 %vm1976_vm0, %v1974_v0  ;;  %v370_v12 = vsel %vm2048_vm7, 0.0, %v368_v6  ;;  %v371_v13 = vsel %vm2052_vm8, 0.0, %v369_v7  ;;  %v1629_v6 = vld [vmem:[%s1589_s5] ss:$0 sm:$0xff] }
  0xf6   :  { %v384_v14 = vpack.c.bf16 %v365_v10, %v364_v8  ;;  %v491_v15 = vpack.c.bf16 %v371_v13, %v370_v12  ;;  %1781 = vmatprep.subr.bf16.mxu1 %v1974_v0 }
  0xf8   :  { %1764 = vmatmul.mubr.msk.bf16.vlgmr.msra.gmra.mrb[4].mxu0 %vm396_vm9, %v384_v14 }
  0xf9   :  { %1774 = vmatpush3.bf16.msra.mxu0 %v1938_v11  ;;  %1777 = vmatprep.mubr.msk.bf16.mxu0 %vm1976_vm0, %v1974_v0 }
  0xfa   :  { %1775 = vmatprep.subr.bf16.mxu0 %v1974_v0 }
  0xfc   :  { %1770 = vmatmul.mubr.msk.bf16.vlgmr.msra.gmra.mrb[12].mxu1 %vm396_vm9, %v491_v15 }
  0xfd   :  { %1776 = vmatpush3.bf16.msra.mxu0 %v1939_v19  ;;  %1782 = vmatpush3.bf16.msra.mxu1 %v1940_v20  ;;  %v1946_v19 = vld [vmem:[%s2188_s1] sm:$0xff]   ;;  %s1606_s1 = sld [smem:[%s2360_s0 + %s2004_s28]]  }
  0xfe   :  { %1783 = vmatprep.subr.bf16.mxu1 %v1974_v0  ;;  %1789 = vmatprep.subr.bf16.mxu0 %v1974_v0 }
  0xff   :  { %1785 = vmatprep.mubr.msk.bf16.mxu1 %vm1976_vm0, %v1974_v0 }
 0x100   :  { %1778 = vmatmul.mubr.msk.bf16.vlgmr.msra.gmra.mrb[8].mxu0 %vm563_vm10, %v546_v27 }
 0x101   :  { %1784 = vmatpush3.bf16.msra.mxu1 %v1941_v28  ;;  %1790 = vmatpush3.bf16.msra.mxu0 %v1942_v29 }
 0x102   :  { %1791 = vmatprep.subr.bf16.mxu0 %v1974_v0  ;;  %1793 = vmatprep.mubr.msk.bf16.mxu0 %vm1976_vm0, %v1974_v0 }
 0x103   :  { %1797 = vmatprep.subr.bf16.mxu1 %v1974_v0 }
 0x104   :  { %1786 = vmatmul.mubr.msk.bf16.vlgmr.msra.gmra.mrb[16].mxu1 %vm563_vm10, %v610_v32 }
 0x105   :  { %1792 = vmatpush3.bf16.msra.mxu0 %v1943_v33  ;;  %1799 = vmatprep.mubr.msk.bf16.mxu1 %vm1976_vm0, %v1974_v0 }
 0x106   :  { %1803 = vmatprep.subr.bf16.mxu0 %v1974_v0  ;;  %1798 = vmatpush3.bf16.msra.mxu1 %v1944_v37  ;;  %v1948_v37 = vld [vmem:[%s1595_s9 + $0x8] sm:$0xff]  }
 0x107   :  { %1809 = vmatprep.subr.bf16.mxu1 %v1974_v0 }
 0x108   :  { %1794 = vmatmul.mubr.msk.bf16.vlgmr.msra.gmra.mrb[12].mxu0 %vm563_vm10, %v673_v36  ;;  %v1947_v36 = vld [vmem:[%s1595_s9] sm:$0xff]  }
 0x109   :  { %1805 = vmatprep.mubr.msk.bf16.mxu0 %vm1976_vm0, %v1974_v0  ;;  %1804 = vmatpush3.bf16.msra.mxu0 %v1945_v38  ;;  %v1949_v38 = vld [vmem:[%s1594_s13] sm:$0xff]  }
 0x10a   :  { %1815 = vmatprep.subr.bf16.mxu0 %v1974_v0 }
 0x1c7   :  { %v434_v39 = vpop.f32.mrb[8].mxu1 }
 0x1c8   :  { %v1759_v40 = vpop.f32.mrb[9].mxu1 }
 0x1c9   :  { %v437_v41 = vpop.f32.mrb[10].mxu1 }
 0x1ca   :  { %v1760_v42 = vpop.f32.mrb[11].mxu1 }
 0x1cb   :  { %v484_v43 = vpop.f32.mrb[4].mxu0 }
 0x1cc   :  { %v485_v44 = vadd.f32 %v484_v43, %v434_v39  ;;  %v1765_v45 = vpop.f32.mrb[5].mxu0  ;;  %v1950_v39 = vld [vmem:[%s1594_s13 + $0x8] sm:$0xff]  }
 0x1cd   :  { %v487_v46 = vpop.f32.mrb[6].mxu0 }
 0x1ce   :  { %v488_v47 = vadd.f32 %v487_v46, %v437_v41  ;;  %v1766_v48 = vpop.f32.mrb[7].mxu0 }
 0x1cf   :  { %v537_v49 = vpop.f32.mrb[12].mxu1 }
 0x1d0   :  { %v544_v50 = vadd.f32 %v537_v49, %v485_v44  ;;  %v1771_v51 = vpop.f32.mrb[13].mxu1 }
 0x1d1   :  { %v540_v52 = vpop.f32.mrb[14].mxu1  ;;  %v1636_v51 = vld [vmem:[%s1593_s21] ss:$0 sm:$0xff] }
 0x1d2   :  { %v545_v53 = vadd.f32 %v540_v52, %v488_v47  ;;  %v1772_v54 = vpop.f32.mrb[15].mxu1 }
 0x1d3   :  { %v601_v55 = vpop.f32.mrb[8].mxu0 }
 0x1d4   :  { %v608_v56 = vadd.f32 %v601_v55, %v544_v50  ;;  %v1779_v57 = vpop.f32.mrb[9].mxu0 }
 0x1d5   :  { %v604_v58 = vpop.f32.mrb[10].mxu0 }
 0x1d6   :  { %v609_v59 = vadd.f32 %v604_v58, %v545_v53  ;;  %v1780_v60 = vpop.f32.mrb[11].mxu0 }
 0x1d7   :  { %v664_v61 = vpop.f32.mrb[16].mxu1 }
 0x1d8   :  { %v671_v62 = vadd.f32 %v664_v61, %v608_v56  ;;  %v1787_v63 = vpop.f32.mrb[17].mxu1 }
 0x1d9   :  { %v667_v1 = vpop.f32.mrb[18].mxu1 }
 0x1da   :  { %v672_v3 = vadd.f32 %v667_v1, %v609_v59  ;;  %v1788_v4 = vpop.f32.mrb[19].mxu1 }
 0x1db   :  { %v727_v5 = vpop.f32.mrb[12].mxu0 }
 0x1dc   :  { %v734_v7 = vadd.f32 %v727_v5, %v671_v62  ;;  %v1795_v8 = vpop.f32.mrb[13].mxu0  ;;  %v1951_v62 = vld [vmem:[%s2231_s17] sm:$0xff]  }
 0x1dd   :  { %v730_v10 = vpop.f32.mrb[14].mxu0 }
 0x1de   :  { %v743_v11 = vadd.f32 %v1629_v6, %v734_v7  ;;  %v735_v12 = vadd.f32 %v730_v10, %v672_v3  ;;  %v1796_v13 = vpop.f32.mrb[15].mxu0 }
 0x1e0   :  { %v745_v14 = vmax.f32 %v743_v11, 0.0  ;;  %v744_v15 = vadd.f32 %v1629_v6, %v735_v12  ;;  %v1952_v12 = vld [vmem:[%s2231_s17 + $0x8] sm:$0xff]  }
 0x1e2   :  { %v746_v16 = vmax.f32 %v744_v15, 0.0  ;;  %v747_v18 = vrot.slane %v745_v14, 7  ;;  %v753_v20 = vrot.slane %v745_v14, 1 }
 0x1e4   :  { %v748_v23 = vrot.slane %v746_v16, 7  ;;  %v754_v24 = vrot.slane %v746_v16, 1  ;;  %v762_v25 = vpack.c.bf16 %v746_v16, %v745_v14 }
 0x1e6   :  { %v749_v26 = vsel %vm160_vm3, %v747_v18, %v748_v23  ;;  %v750_v27 = vsel %vm160_vm3, %v748_v23, %v747_v18  ;;  %v755_v28 = vsel %vm171_vm4, %v753_v20, %v754_v24  ;;  %v756_v29 = vsel %vm171_vm4, %v754_v24, %v753_v20  ;;  %1800 = vmatmul.mubr.msk.bf16.vlgmr.msra.gmra.mrb[20].mxu1 %vm396_vm9, %v762_v25  ;;  %v1953_v18 = vld [vmem:[%s1599_s25] sm:$0xff]   ;;  %v1956_v23 = vld [vmem:[%s1599_s25 + $0x10] sm:$0xff]   ;;  %v1957_v24 = vld [vmem:[%s1598_s29 + $0x8] sm:$0xff]  }
 0x1e7   :  { %1810 = vmatpush3.bf16.msra.mxu1 %v1946_v19  ;;  %v751_v30 = vsel %vm2034_vm5, 0.0, %v750_v27  ;;  %v752_v31 = vsel %vm2039_vm6, 0.0, %v749_v26  ;;  %1811 = vmatprep.mubr.msk.bf16.mxu1 %vm1976_vm0, %v1974_v0  ;;  %v757_v32 = vsel %vm2048_vm7, 0.0, %v755_v28  ;;  %v758_v33 = vsel %vm2052_vm8, 0.0, %v756_v29  ;;  %v1954_v19 = vld [vmem:[%s1599_s25 + $0x8] sm:$0xff]   ;;  %v1955_v20 = vld [vmem:[%s1598_s29] sm:$0xff]  }
 0x1e8   :  { %v759_v34 = vpack.c.bf16 %v752_v31, %v751_v30  ;;  %v865_v35 = vpack.c.bf16 %v758_v33, %v757_v32  ;;  %1823 = vmatprep.subr.bf16.mxu1 %v1974_v0  ;;  %v1958_v25 = vld [vmem:[%s1599_s25 + $0x18] sm:$0xff]   ;;  %v1959_v26 = vld [vmem:[%s1598_s29 + $0x10] sm:$0xff]  }
 0x1e9   :  { %v1961_v27 = vld [vmem:[%s1598_s29 + $0x18] sm:$0xff]  }
 0x1ea   :  { %1806 = vmatmul.mubr.msk.bf16.vlgmr.msra.gmra.mrb[16].mxu0 %vm396_vm9, %v759_v34 }
 0x1eb   :  { %1819 = vmatprep.mubr.msk.bf16.mxu0 %vm1976_vm0, %v1974_v0  ;;  %1816 = vmatpush3.bf16.msra.mxu0 %v1947_v36 }
 0x1ec   :  { %1817 = vmatprep.subr.bf16.mxu0 %v1974_v0 }
 0x1ee   :  { %1812 = vmatmul.mubr.msk.bf16.vlgmr.msra.gmra.mrb[24].mxu1 %vm396_vm9, %v865_v35 }
 0x1ef   :  { %1827 = vmatprep.mubr.msk.bf16.mxu1 %vm1976_vm0, %v1974_v0  ;;  %1818 = vmatpush3.bf16.msra.mxu0 %v1948_v37 }
 0x1f0   :  { %1824 = vmatpush3.bf16.msra.mxu1 %v1949_v38  ;;  %1831 = vmatprep.subr.bf16.mxu0 %v1974_v0 }
 0x1f1   :  { %1825 = vmatprep.subr.bf16.mxu1 %v1974_v0 }
 0x1f4   :  { %1826 = vmatpush3.bf16.msra.mxu1 %v1950_v39  ;;  %v1646_v39 = vld [vmem:[%s1597_s11] ss:$0 sm:$0xff] }
 0x1f5   :  { %1839 = vmatprep.subr.bf16.mxu1 %v1974_v0 }
 0x2b9   :  { %v808_v40 = vpop.f32.mrb[20].mxu1 }
 0x2ba   :  { %v1801_v41 = vpop.f32.mrb[21].mxu1 }
 0x2bb   :  { %v811_v42 = vpop.f32.mrb[22].mxu1 }
 0x2bc   :  { %v1802_v43 = vpop.f32.mrb[23].mxu1 }
 0x2bd   :  { %v858_v44 = vpop.f32.mrb[16].mxu0 }
 0x2be   :  { %v859_v45 = vadd.f32 %v858_v44, %v808_v40  ;;  %v1807_v46 = vpop.f32.mrb[17].mxu0 }
 0x2bf   :  { %v861_v47 = vpop.f32.mrb[18].mxu0 }
 0x2c0   :  { %v862_v48 = vadd.f32 %v861_v47, %v811_v42  ;;  %v1808_v49 = vpop.f32.mrb[19].mxu0 }
 0x2c1   :  { %v911_v50 = vpop.f32.mrb[24].mxu1 }
 0x2c2   :  { %v918_v52 = vadd.f32 %v911_v50, %v859_v45  ;;  %v1813_v53 = vpop.f32.mrb[25].mxu1  ;;  %v1960_v50 = vld [vmem:[%s2281_s3] sm:$0xff]  }
 0x2c3   :  { %v914_v54 = vpop.f32.mrb[26].mxu1 }
 0x2c4   :  { %v927_v55 = vadd.f32 %v1636_v51, %v918_v52  ;;  %v919_v56 = vadd.f32 %v914_v54, %v862_v48  ;;  %v1814_v57 = vpop.f32.mrb[27].mxu1 }
 0x2c6   :  { %v929_v58 = vmax.f32 %v927_v55, 0.0  ;;  %v928_v59 = vadd.f32 %v1636_v51, %v919_v56 }
 0x2c8   :  { %v930_v60 = vmax.f32 %v928_v59, 0.0  ;;  %v931_v61 = vrot.slane %v929_v58, 7  ;;  %v937_v63 = vrot.slane %v929_v58, 1 }
 0x2ca   :  { %v932_v1 = vrot.slane %v930_v60, 7  ;;  %v938_v3 = vrot.slane %v930_v60, 1  ;;  %v948_v4 = vpack.c.bf16 %v930_v60, %v929_v58 }
 0x2cc   :  { %v933_v5 = vsel %vm160_vm3, %v931_v61, %v932_v1  ;;  %v934_v6 = vsel %vm160_vm3, %v932_v1, %v931_v61  ;;  %v939_v7 = vsel %vm171_vm4, %v937_v63, %v938_v3  ;;  %v940_v8 = vsel %vm171_vm4, %v938_v3, %v937_v63  ;;  %1820 = vmatmul.mubr.msk.bf16.vlgmr.msra.gmra.mrb[20].mxu0 %vm563_vm10, %v948_v4  ;;  %v1962_v61 = vld [vmem:[%s2281_s3 + $0x8] sm:$0xff]   ;;  %v1965_v63 = vld [vmem:[%s2291_s7] sm:$0xff]   ;;  %v1968_v4 = vld [vmem:[%s2291_s7 + $0x18] sm:$0xff]  }
 0x2cd   :  { %1832 = vmatpush3.bf16.msra.mxu0 %v1951_v62  ;;  %v935_v10 = vsel %vm2034_vm5, 0.0, %v934_v6  ;;  %v936_v11 = vsel %vm2039_vm6, 0.0, %v933_v5  ;;  %1835 = vmatprep.mubr.msk.bf16.mxu0 %vm1976_vm0, %v1974_v0  ;;  %v941_v13 = vsel %vm2048_vm7, 0.0, %v939_v7  ;;  %v942_v14 = vsel %vm2052_vm8, 0.0, %v940_v8  ;;  %v1966_v3 = vld [vmem:[%s2291_s7 + $0x8] sm:$0xff]   ;;  %v1969_v5 = vld [vmem:[%s2291_s7 + $0x20] sm:$0xff]  }
 0x2ce   :  { %v943_v15 = vpack.c.bf16 %v936_v11, %v935_v10  ;;  %1833 = vmatprep.subr.bf16.mxu0 %v1974_v0  ;;  %v1065_v16 = vpack.c.bf16 %v942_v14, %v941_v13  ;;  %v1970_v6 = vld [vmem:[%s2291_s7 + $0x28] sm:$0xff]   ;;  %v1971_v7 = vld [vmem:[%s2291_s7 + $0x30] sm:$0xff]   ;;  %v1972_v8 = vld [vmem:[%s2291_s7 + $0x38] sm:$0xff]  }
 0x2d0   :  { %1828 = vmatmul.mubr.msk.bf16.vlgmr.msra.gmra.mrb[28].mxu1 %vm563_vm10, %v943_v15 }
 0x2d1   :  { %1834 = vmatpush3.bf16.msra.mxu0 %v1952_v12  ;;  %1847 = vmatprep.mubr.msk.bf16.mxu1 %vm1976_vm0, %v1974_v0 }
 0x2d2   :  { %1851 = vmatprep.subr.bf16.mxu0 %v1974_v0  ;;  %1840 = vmatpush3.bf16.msra.mxu1 %v1953_v18 }
 0x2d3   :  { %1841 = vmatprep.subr.bf16.mxu1 %v1974_v0 }
 0x2d4   :  { %1836 = vmatmul.mubr.msk.bf16.vlgmr.msra.gmra.mrb[24].mxu0 %vm563_vm10, %v1065_v16 }
 0x2d5   :  { %1859 = vmatprep.mubr.msk.bf16.mxu0 %vm1976_vm0, %v1974_v0  ;;  %1852 = vmatpush3.bf16.msra.mxu0 %v1955_v20 }
 0x2d6   :  { %1842 = vmatpush3.bf16.msra.mxu1 %v1954_v19  ;;  %1853 = vmatprep.subr.bf16.mxu0 %v1974_v0 }
 0x2d7   :  { %1843 = vmatprep.subr.bf16.mxu1 %v1974_v0 }
 0x2d9   :  { %1854 = vmatpush3.bf16.msra.mxu0 %v1957_v24  ;;  %v1662_v24 = vld [vmem:[%s1601_s15] ss:$0 sm:$0xff] }
 0x2da   :  { %1844 = vmatpush3.bf16.msra.mxu1 %v1956_v23  ;;  %1855 = vmatprep.subr.bf16.mxu0 %v1974_v0 }
 0x2db   :  { %1845 = vmatprep.subr.bf16.mxu1 %v1974_v0 }
 0x2dd   :  { %1856 = vmatpush3.bf16.msra.mxu0 %v1959_v26 }
 0x2de   :  { %1846 = vmatpush3.bf16.msra.mxu1 %v1958_v25  ;;  %1857 = vmatprep.subr.bf16.mxu0 %v1974_v0 }
 0x2df   :  { %1863 = vmatprep.subr.bf16.mxu1 %v1974_v0 }
 0x2e1   :  { %1858 = vmatpush3.bf16.msra.mxu0 %v1961_v27 }
 0x2e2   :  { %1875 = vmatprep.subr.bf16.mxu0 %v1974_v0 }
 0x39f   :  { %v1002_v28 = vpop.f32.mrb[20].mxu0 }
 0x3a0   :  { %v1821_v29 = vpop.f32.mrb[21].mxu0 }
 0x3a1   :  { %v1005_v30 = vpop.f32.mrb[22].mxu0 }
 0x3a2   :  { %v1822_v31 = vpop.f32.mrb[23].mxu0 }
 0x3a3   :  { %v1058_v32 = vpop.f32.mrb[28].mxu1 }
 0x3a4   :  { %v1059_v33 = vadd.f32 %v1058_v32, %v1002_v28  ;;  %v1829_v34 = vpop.f32.mrb[29].mxu1 }
 0x3a5   :  { %v1061_v35 = vpop.f32.mrb[30].mxu1  ;;  %v1973_v34 = vld [vmem:[%s1604_s19] sm:$0xff]  }
 0x3a6   :  { %v1062_v36 = vadd.f32 %v1061_v35, %v1005_v30  ;;  %v1830_v37 = vpop.f32.mrb[31].mxu1  ;;  %v1663_v35 = vld [vmem:[%s1603_s23] ss:$0 sm:$0xff] }
 0x3a7   :  { %v1119_v38 = vpop.f32.mrb[24].mxu0 }
 0x3a8   :  { %v1126_v40 = vadd.f32 %v1119_v38, %v1059_v33  ;;  %v1837_v41 = vpop.f32.mrb[25].mxu0 }
 0x3a9   :  { %v1122_v42 = vpop.f32.mrb[26].mxu0 }
 0x3aa   :  { %v1135_v43 = vadd.f32 %v1646_v39, %v1126_v40  ;;  %v1127_v44 = vadd.f32 %v1122_v42, %v1062_v36  ;;  %v1838_v45 = vpop.f32.mrb[27].mxu0 }
 0x3ab   :  { %v1672_v45 = vld [vmem:[%s1605_s27] ss:$0 sm:$0xff] }
 0x3ac   :  { %v1137_v46 = vmax.f32 %v1135_v43, 0.0  ;;  %v1136_v47 = vadd.f32 %v1646_v39, %v1127_v44 }
 0x3ae   :  { %v1138_v48 = vmax.f32 %v1136_v47, 0.0  ;;  %v1139_v49 = vrot.slane %v1137_v46, 7  ;;  %v1145_v51 = vrot.slane %v1137_v46, 1 }
 0x3b0   :  { %v1140_v52 = vrot.slane %v1138_v48, 7  ;;  %v1146_v53 = vrot.slane %v1138_v48, 1  ;;  %v1160_v54 = vpack.c.bf16 %v1138_v48, %v1137_v46 }
 0x3b2   :  { %v1141_v55 = vsel %vm160_vm3, %v1139_v49, %v1140_v52  ;;  %v1142_v56 = vsel %vm160_vm3, %v1140_v52, %v1139_v49  ;;  %v1147_v57 = vsel %vm171_vm4, %v1145_v51, %v1146_v53  ;;  %v1148_v58 = vsel %vm171_vm4, %v1146_v53, %v1145_v51  ;;  %1848 = vmatmul.mubr.msk.bf16.vlgmr.msra.gmra.mrb[32].mxu1 %vm1193_vm11, %v1160_v54 }
 0x3b3   :  { %1864 = vmatpush3.bf16.msra.mxu1 %v1960_v50  ;;  %v1143_v59 = vsel %vm2034_vm5, 0.0, %v1142_v56  ;;  %v1144_v60 = vsel %vm2039_vm6, 0.0, %v1141_v55  ;;  %1871 = vmatprep.mubr.msk.bf16.mxu1 %vm1976_vm0, %v1974_v0  ;;  %v1149_v2 = vsel %vm2048_vm7, 0.0, %v1147_v57  ;;  %v1150_v62 = vsel %vm2052_vm8, 0.0, %v1148_v58 }
 0x3b4   :  { %1865 = vmatprep.subr.bf16.mxu1 %v1974_v0  ;;  %v1151_v1 = vpack.c.bf16 %v1144_v60, %v1143_v59  ;;  %v1306_v9 = vpack.c.bf16 %v1150_v62, %v1149_v2 }
 0x3b6   :  { %1860 = vmatmul.mubr.msk.bf16.vlgmr.msra.gmra.mrb[28].mxu0 %vm1193_vm11, %v1151_v1 }
 0x3b7   :  { %1866 = vmatpush3.bf16.msra.mxu1 %v1962_v61  ;;  %1876 = vmatpush3.bf16.msra.mxu0 %v1965_v63 }
 0x3b8   :  { %1867 = vmatprep.subr.bf16.mxu1 %v1974_v0  ;;  %1877 = vmatprep.subr.bf16.mxu0 %v1974_v0 }
 0x3b9   :  { %1891 = vmatprep.mubr.msk.bf16.mxu0 %vm1976_vm0, %v1974_v0 }
 0x3bb   :  { %1868 = vmatpush3.bf16.msra.mxu1 %v1963_v17  ;;  %1878 = vmatpush3.bf16.msra.mxu0 %v1966_v3 }
 0x3bc   :  { %1869 = vmatprep.subr.bf16.mxu1 %v1974_v0  ;;  %1879 = vmatprep.subr.bf16.mxu0 %v1974_v0 }
 0x3bf   :  { %1870 = vmatpush3.bf16.msra.mxu1 %v1964_v21  ;;  %1880 = vmatpush3.bf16.msra.mxu0 %v1967_v22 }
 0x3c0   :  { %1895 = vmatprep.subr.bf16.mxu1 %v1974_v0  ;;  %1881 = vmatprep.subr.bf16.mxu0 %v1974_v0 }
 0x3c2   :  { %1872 = vmatmul.mubr.msk.bf16.vlgmr.msra.gmra.mrb[36].mxu1 %vm1193_vm11, %v1306_v9 }
 0x3c3   :  { %1897 = vmatprep.mubr.msk.bf16.mxu1 %vm1976_vm0, %v1974_v0  ;;  %1882 = vmatpush3.bf16.msra.mxu0 %v1968_v4 }
 0x3c4   :  { %1883 = vmatprep.subr.bf16.mxu0 %v1974_v0  ;;  %1896 = vmatpush3.bf16.msra.mxu1 %v1973_v34 }
 0x3c7   :  { %1884 = vmatpush3.bf16.msra.mxu0 %v1969_v5 }
 0x3c8   :  { %1885 = vmatprep.subr.bf16.mxu0 %v1974_v0 }
 0x3cb   :  { %1886 = vmatpush3.bf16.msra.mxu0 %v1970_v6 }
 0x3cc   :  { %1887 = vmatprep.subr.bf16.mxu0 %v1974_v0 }
 0x3cf   :  { %1888 = vmatpush3.bf16.msra.mxu0 %v1971_v7 }
 0x3d0   :  { %1889 = vmatprep.subr.bf16.mxu0 %v1974_v0 }
 0x3d3   :  { %1890 = vmatpush3.bf16.msra.mxu0 %v1972_v8 }
 0x485   :  { %v1231_v10 = vpop.f32.mrb[32].mxu1 }
 0x486   :  { %v1849_v11 = vpop.f32.mrb[33].mxu1 }
 0x487   :  { %v1234_v12 = vpop.f32.mrb[34].mxu1 }
 0x488   :  { %v1850_v13 = vpop.f32.mrb[35].mxu1 }
 0x489   :  { %v1299_v14 = vpop.f32.mrb[28].mxu0 }
 0x48a   :  { %v1300_v15 = vadd.f32 %v1299_v14, %v1231_v10  ;;  %v1861_v16 = vpop.f32.mrb[29].mxu0 }
 0x48b   :  { %v1302_v18 = vpop.f32.mrb[30].mxu0 }
 0x48c   :  { %v1303_v19 = vadd.f32 %v1302_v18, %v1234_v12  ;;  %v1862_v20 = vpop.f32.mrb[31].mxu0 }
 0x495   :  { %v1376_v23 = vpop.f32.mrb[36].mxu1 }
 0x496   :  { %v1383_v0 = vadd.f32 %v1376_v23, %v1300_v15  ;;  %v1873_v25 = vpop.f32.mrb[37].mxu1 }
 0x497   :  { %v1379_v26 = vpop.f32.mrb[38].mxu1 }
 0x498   :  { %v1392_v27 = vadd.f32 %v1662_v24, %v1383_v0  ;;  %v1384_v28 = vadd.f32 %v1379_v26, %v1303_v19  ;;  %v1874_v29 = vpop.f32.mrb[39].mxu1 }
 0x49a   :  { %v1393_v30 = vadd.f32 %v1662_v24, %v1384_v28  ;;  %v1394_v31 = vmax.f32 %v1392_v27, 0.0 }
 0x49c   :  { %v1395_v32 = vmax.f32 %v1393_v30, 0.0 }
 0x49e   :  { %v1396_v33 = vpack.c.bf16 %v1395_v32, %v1394_v31 }
 0x4a0   :  { %1892 = vmatmul.mubr.bf16.vlgmr.msra.gmra.mrb[32].mxu0 %v1396_v33 }
 0x573   :  { %v1502_v36 = vpop.f32.mrb[32].mxu0 }
 0x574   :  { %v1503_v37 = vadd.f32 %v1663_v35, %v1502_v36  ;;  %v1893_v38 = vpop.f32.mrb[33].mxu0 }
 0x575   :  { %v1505_v39 = vpop.f32.mrb[34].mxu0 }
 0x576   :  { %v1506_v40 = vadd.f32 %v1663_v35, %v1505_v39  ;;  %v1894_v41 = vpop.f32.mrb[35].mxu0  ;;  %v1509_v42 = vmax.f32 %v1503_v37, 0.0 }
 0x578   :  { %v1510_v43 = vmax.f32 %v1506_v40, 0.0 }
 0x57a   :  { %v1511_v44 = vpack.c.bf16 %v1510_v43, %v1509_v42 }
 0x57c   :  { %1898 = vmatmul.mubr.msk.bf16.vlgmr.msra.gmra.mrb[40].mxu1 %vm396_vm9, %v1511_v44 }
 0x64f   :  { %v1564_v46 = vpop.f32.mrb[40].mxu1 }
 0x650   :  { %v1565_v47 = vadd.f32 %v1672_v45, %v1564_v46  ;;  %v1899_v48 = vpop.f32.mrb[41].mxu1 }
 0x651   :  { %v1567_v49 = vpop.f32.mrb[42].mxu1 }
 0x652   :  { %1572 = vst.msk [vmem:[%s1606_s1] sm:$0xff] %vm1571_vm12, %v1565_v47  ;;  %v1568_v50 = vadd.f32 %v1672_v45, %v1567_v49  ;;  %v1900_v51 = vpop.f32.mrb[43].mxu1 }
 0x654   :  { %1573 = vst.msk [vmem:[%s1606_s1 + $0x8] sm:$0xff] %vm1571_vm12, %v1568_v50 }

</bundles_post_ra>
